<compile_context>
chip_gen: v7x
topology: tpu7x:2x2x1
jax: 0.10.0
libtpu: 0.0.40
codegen_flags: <defaults>
</compile_context>

<pallas_src>
import jax
import jax.numpy as jnp
from jax import lax
from jax.experimental import pallas as pl
from jax.experimental.pallas import tpu as pltpu

BN_EPS = 1e-5      # nn.BatchNorm1d default
NORM_EPS = 1e-12   # F.normalize default


# ----------------------------- fused kernel ---------------------------------

def byol_fused_kernel(
    x_ref,                                                   # (2B, FLAT) bf16 (stacked views)
    enc_w_ref, enc_b_ref,                                    # encoder stand-in
    pw1_ref, pb1_ref, pg_ref, pbt_ref, pw2_ref, pb2_ref,     # projector MLPHead
    qw1_ref, qb1_ref, qg_ref, qbt_ref, qw2_ref, qb2_ref,     # predictor MLPHead
    o_ref,                                                   # (1, 1) f32 loss
):
    nb = x_ref.shape[0]
    b = nb // 2          # per-view batch (static)

    def linear(x, w_ref, b_ref):
        # bf16 operands on the MXU, f32 accumulation; bias add in f32 on the VPU.
        y = jnp.dot(x.astype(jnp.bfloat16), w_ref[...],
                    preferred_element_type=jnp.float32)
        return y + b_ref[...]

    def bn_relu(h, g_ref, bt_ref):
        # BatchNorm1d training mode (biased batch variance), computed per view
        # so the stacked pass matches two separate PyTorch forward calls.
        def norm(hh):
            mean = jnp.mean(hh, axis=0, keepdims=True)
            d = hh - mean
            var = jnp.mean(d * d, axis=0, keepdims=True)
            return d * lax.rsqrt(var + BN_EPS)          # rsqrt -> EUP slot

        hn = jnp.concatenate([norm(h[:b]), norm(h[b:])], axis=0)
        hn = hn * g_ref[...] + bt_ref[...]
        return jnp.maximum(hn, 0.0)

    def mlp_head(x, w1_ref, b1_ref, g_ref, bt_ref, w2_ref, b2_ref):
        h = linear(x, w1_ref, b1_ref)
        return linear(bn_relu(h, g_ref, bt_ref), w2_ref, b2_ref)

    # TODO(synk): full ResNet50 backbone is not reimplemented; this is a
    # flatten -> linear -> ReLU stand-in encoder producing enc_dim features.
    f = jnp.maximum(linear(x_ref[...], enc_w_ref, enc_b_ref), 0.0)

    # Projector computed once, reused for both online (-> predictor) and target
    # branches (target params == online params at init).
    proj = mlp_head(f, pw1_ref, pb1_ref, pg_ref, pbt_ref, pw2_ref, pb2_ref)
    pred = mlp_head(proj, qw1_ref, qb1_ref, qg_ref, qbt_ref, qw2_ref, qb2_ref)

    # Loss pairing: (z1, t2) and (z2, t1) -> swap the two view halves of proj.
    t_sw = jnp.concatenate([proj[b:], proj[:b]], axis=0)

    def l2_normalize(v):
        # x / max(||x||, eps)  ==  x * rsqrt(max(||x||^2, eps^2))  (EUP rsqrt)
        ss = jnp.sum(v * v, axis=-1, keepdims=True)
        return v * lax.rsqrt(jnp.maximum(ss, NORM_EPS * NORM_EPS))

    cos = jnp.sum(l2_normalize(pred) * l2_normalize(t_sw),
                  axis=-1, keepdims=True)                     # (2B, 1)
    # loss_fn(z1,t2) + loss_fn(z2,t1)
    #   = (2 - 2*mean(cos half1)) + (2 - 2*mean(cos half2)) = 4 - 4*mean(cos all)
    o_ref[...] = 4.0 - 4.0 * jnp.mean(cos, axis=0, keepdims=True)


# ----------------------------- wrapper ---------------------------------------

_VMEM = pl.BlockSpec(memory_space=pltpu.MemorySpace.VMEM)


def byol_forward(params, x1, x2):
    B = x1.shape[0]
    # Stack the two augmented views into one (2B, C*H*W) slab (NCHW flattened).
    xf = jnp.concatenate(
        [x1.reshape(B, -1), x2.reshape(B, -1)], axis=0
    ).astype(jnp.bfloat16)

    args = (xf, params["enc_w"], params["enc_b"],
            *params["proj"], *params["pred"])
    out = pl.pallas_call(
        byol_fused_kernel,
        out_shape=jax.ShapeDtypeStruct((1, 1), jnp.float32),
        in_specs=[_VMEM] * len(args),
        out_specs=_VMEM,
    )(*args)
    return out[0, 0]


# ----------------------------- params ----------------------------------------

def init_linear(key, in_dim, out_dim):
    kw, kb = jax.random.split(key)
    bound = 1.0 / (in_dim ** 0.5)
    w = jax.random.uniform(kw, (in_dim, out_dim), jnp.float32, -bound, bound)
    b = jax.random.uniform(kb, (1, out_dim), jnp.float32, -bound, bound)
    # Weight is an MXU operand -> store bf16 once; bias stays f32 (VPU add).
    return w.astype(jnp.bfloat16), b


def init_mlp_head(key, in_dim, hidden_dim, out_dim):
    k1, k2 = jax.random.split(key)
    w1, b1 = init_linear(k1, in_dim, hidden_dim)
    gamma = jnp.ones((1, hidden_dim), jnp.float32)   # BatchNorm1d default init
    beta = jnp.zeros((1, hidden_dim), jnp.float32)
    w2, b2 = init_linear(k2, hidden_dim, out_dim)
    return (w1, b1, gamma, beta, w2, b2)


def init_byol_params(key, flat_in, enc_dim, hidden_dim, feature_dim):
    ke, kp, kq = jax.random.split(key, 3)
    enc_w, enc_b = init_linear(ke, flat_in, enc_dim)
    proj = init_mlp_head(kp, enc_dim, hidden_dim, feature_dim)
    pred = init_mlp_head(kq, feature_dim, hidden_dim, feature_dim)
    return {"enc_w": enc_w, "enc_b": enc_b, "proj": proj, "pred": pred}


# ----------------------------- main -------------------------------------------

if __name__ == "__main__":
    B, C, H, W = 8, 3, 16, 16
    ENC_DIM, HIDDEN, FEAT = 256, 256, 128

    key = jax.random.PRNGKey(0)
    kx1, kx2, kparam = jax.random.split(key, 3)

    x1 = jax.random.normal(kx1, (B, C, H, W), jnp.float32)
    x2 = jax.random.normal(kx2, (B, C, H, W), jnp.float32)
    params = init_byol_params(kparam, C * H * W, ENC_DIM, HIDDEN, FEAT)

    loss = jax.jit(byol_forward)(params, x1, x2)
    jax.block_until_ready(loss)
    print("KERNEL_OK")
</pallas_src>

<mosaic_0001>
module attributes {stable_mosaic.version = 11 : i64} {
  func.func @byol_fused_kernel(%arg0: memref<16x768xbf16, #tpu.memory_space<vmem>>, %arg1: memref<768x256xbf16, #tpu.memory_space<vmem>>, %arg2: memref<1x256xf32, #tpu.memory_space<vmem>>, %arg3: memref<256x256xbf16, #tpu.memory_space<vmem>>, %arg4: memref<1x256xf32, #tpu.memory_space<vmem>>, %arg5: memref<1x256xf32, #tpu.memory_space<vmem>>, %arg6: memref<1x256xf32, #tpu.memory_space<vmem>>, %arg7: memref<256x128xbf16, #tpu.memory_space<vmem>>, %arg8: memref<1x128xf32, #tpu.memory_space<vmem>>, %arg9: memref<128x256xbf16, #tpu.memory_space<vmem>>, %arg10: memref<1x256xf32, #tpu.memory_space<vmem>>, %arg11: memref<1x256xf32, #tpu.memory_space<vmem>>, %arg12: memref<1x256xf32, #tpu.memory_space<vmem>>, %arg13: memref<256x128xbf16, #tpu.memory_space<vmem>>, %arg14: memref<1x128xf32, #tpu.memory_space<vmem>>, %arg15: memref<1x1xf32, #tpu.memory_space<vmem>>) attributes {dimension_semantics = [], scalar_prefetch = 0 : i64, scratch_operands = 0 : i64, tpu.core_type = #tpu.core_type<tc>} {
    %c0 = arith.constant 0 : index
    %c0_0 = arith.constant 0 : index
    %0 = vector.load %arg0[%c0, %c0_0] : memref<16x768xbf16, #tpu.memory_space<vmem>>, vector<16x768xbf16>
    %c0_1 = arith.constant 0 : index
    %c0_2 = arith.constant 0 : index
    %1 = vector.load %arg1[%c0_1, %c0_2] : memref<768x256xbf16, #tpu.memory_space<vmem>>, vector<768x256xbf16>
    %cst = arith.constant dense<0.000000e+00> : vector<16x256xf32>
    %2 = tpu.matmul %0, %1, %cst {dimension_numbers = #tpu.dot_dimension_numbers<[1], [0], [0], [1], [0, 0, 1, 1], [], []>} : vector<16x768xbf16>, vector<768x256xbf16>, vector<16x256xf32> -> vector<16x256xf32>
    %c0_3 = arith.constant 0 : index
    %c0_4 = arith.constant 0 : index
    %3 = vector.load %arg2[%c0_3, %c0_4] : memref<1x256xf32, #tpu.memory_space<vmem>>, vector<1x256xf32>
    %4 = vector.broadcast %3 : vector<1x256xf32> to vector<16x256xf32>
    %5 = arith.addf %2, %4 : vector<16x256xf32>
    %cst_5 = arith.constant 0.000000e+00 : f32
    %6 = vector.broadcast %cst_5 : f32 to vector<16x256xf32>
    %7 = arith.maximumf %5, %6 : vector<16x256xf32>
    %8 = arith.truncf %7 : vector<16x256xf32> to vector<16x256xbf16>
    %c0_6 = arith.constant 0 : index
    %c0_7 = arith.constant 0 : index
    %9 = vector.load %arg3[%c0_6, %c0_7] : memref<256x256xbf16, #tpu.memory_space<vmem>>, vector<256x256xbf16>
    %cst_8 = arith.constant dense<0.000000e+00> : vector<16x256xf32>
    %10 = tpu.matmul %8, %9, %cst_8 {dimension_numbers = #tpu.dot_dimension_numbers<[1], [0], [0], [1], [0, 0, 1, 1], [], []>} : vector<16x256xbf16>, vector<256x256xbf16>, vector<16x256xf32> -> vector<16x256xf32>
    %c0_9 = arith.constant 0 : index
    %c0_10 = arith.constant 0 : index
    %11 = vector.load %arg4[%c0_9, %c0_10] : memref<1x256xf32, #tpu.memory_space<vmem>>, vector<1x256xf32>
    %12 = vector.broadcast %11 : vector<1x256xf32> to vector<16x256xf32>
    %13 = arith.addf %10, %12 : vector<16x256xf32>
    %14 = vector.extract_strided_slice %13 {offsets = [0, 0], sizes = [8, 256], strides = [1, 1]} : vector<16x256xf32> to vector<8x256xf32>
    %cst_11 = arith.constant dense<0.000000e+00> : vector<256xf32>
    %15 = vector.multi_reduction <add>, %14, %cst_11 [0] : vector<8x256xf32> to vector<256xf32>
    %16 = vector.shape_cast %15 : vector<256xf32> to vector<1x256xf32>
    %cst_12 = arith.constant 8.000000e+00 : f32
    %17 = vector.broadcast %cst_12 : f32 to vector<1x256xf32>
    %18 = arith.divf %16, %17 : vector<1x256xf32>
    %19 = vector.broadcast %18 : vector<1x256xf32> to vector<8x256xf32>
    %20 = arith.subf %14, %19 : vector<8x256xf32>
    %21 = arith.mulf %20, %20 : vector<8x256xf32>
    %cst_13 = arith.constant dense<0.000000e+00> : vector<256xf32>
    %22 = vector.multi_reduction <add>, %21, %cst_13 [0] : vector<8x256xf32> to vector<256xf32>
    %23 = vector.shape_cast %22 : vector<256xf32> to vector<1x256xf32>
    %cst_14 = arith.constant 8.000000e+00 : f32
    %24 = vector.broadcast %cst_14 : f32 to vector<1x256xf32>
    %25 = arith.divf %23, %24 : vector<1x256xf32>
    %cst_15 = arith.constant 9.99999974E-6 : f32
    %26 = vector.broadcast %cst_15 : f32 to vector<1x256xf32>
    %27 = arith.addf %25, %26 : vector<1x256xf32>
    %28 = math.rsqrt %27 : vector<1x256xf32>
    %29 = vector.broadcast %28 : vector<1x256xf32> to vector<8x256xf32>
    %30 = arith.mulf %20, %29 : vector<8x256xf32>
    %31 = vector.extract_strided_slice %13 {offsets = [8, 0], sizes = [8, 256], strides = [1, 1]} : vector<16x256xf32> to vector<8x256xf32>
    %cst_16 = arith.constant dense<0.000000e+00> : vector<256xf32>
    %32 = vector.multi_reduction <add>, %31, %cst_16 [0] : vector<8x256xf32> to vector<256xf32>
    %33 = vector.shape_cast %32 : vector<256xf32> to vector<1x256xf32>
    %cst_17 = arith.constant 8.000000e+00 : f32
    %34 = vector.broadcast %cst_17 : f32 to vector<1x256xf32>
    %35 = arith.divf %33, %34 : vector<1x256xf32>
    %36 = vector.broadcast %35 : vector<1x256xf32> to vector<8x256xf32>
    %37 = arith.subf %31, %36 : vector<8x256xf32>
    %38 = arith.mulf %37, %37 : vector<8x256xf32>
    %cst_18 = arith.constant dense<0.000000e+00> : vector<256xf32>
    %39 = vector.multi_reduction <add>, %38, %cst_18 [0] : vector<8x256xf32> to vector<256xf32>
    %40 = vector.shape_cast %39 : vector<256xf32> to vector<1x256xf32>
    %cst_19 = arith.constant 8.000000e+00 : f32
    %41 = vector.broadcast %cst_19 : f32 to vector<1x256xf32>
    %42 = arith.divf %40, %41 : vector<1x256xf32>
    %cst_20 = arith.constant 9.99999974E-6 : f32
    %43 = vector.broadcast %cst_20 : f32 to vector<1x256xf32>
    %44 = arith.addf %42, %43 : vector<1x256xf32>
    %45 = math.rsqrt %44 : vector<1x256xf32>
    %46 = vector.broadcast %45 : vector<1x256xf32> to vector<8x256xf32>
    %47 = arith.mulf %37, %46 : vector<8x256xf32>
    %48 = tpu.concatenate %30, %47 in 0 : vector<8x256xf32>, vector<8x256xf32> -> vector<16x256xf32>
    %c0_21 = arith.constant 0 : index
    %c0_22 = arith.constant 0 : index
    %49 = vector.load %arg5[%c0_21, %c0_22] : memref<1x256xf32, #tpu.memory_space<vmem>>, vector<1x256xf32>
    %50 = vector.broadcast %49 : vector<1x256xf32> to vector<16x256xf32>
    %51 = arith.mulf %48, %50 : vector<16x256xf32>
    %c0_23 = arith.constant 0 : index
    %c0_24 = arith.constant 0 : index
    %52 = vector.load %arg6[%c0_23, %c0_24] : memref<1x256xf32, #tpu.memory_space<vmem>>, vector<1x256xf32>
    %53 = vector.broadcast %52 : vector<1x256xf32> to vector<16x256xf32>
    %54 = arith.addf %51, %53 : vector<16x256xf32>
    %cst_25 = arith.constant 0.000000e+00 : f32
    %55 = vector.broadcast %cst_25 : f32 to vector<16x256xf32>
    %56 = arith.maximumf %54, %55 : vector<16x256xf32>
    %57 = arith.truncf %56 : vector<16x256xf32> to vector<16x256xbf16>
    %c0_26 = arith.constant 0 : index
    %c0_27 = arith.constant 0 : index
    %58 = vector.load %arg7[%c0_26, %c0_27] : memref<256x128xbf16, #tpu.memory_space<vmem>>, vector<256x128xbf16>
    %cst_28 = arith.constant dense<0.000000e+00> : vector<16x128xf32>
    %59 = tpu.matmul %57, %58, %cst_28 {dimension_numbers = #tpu.dot_dimension_numbers<[1], [0], [0], [1], [0, 0, 1, 1], [], []>} : vector<16x256xbf16>, vector<256x128xbf16>, vector<16x128xf32> -> vector<16x128xf32>
    %c0_29 = arith.constant 0 : index
    %c0_30 = arith.constant 0 : index
    %60 = vector.load %arg8[%c0_29, %c0_30] : memref<1x128xf32, #tpu.memory_space<vmem>>, vector<1x128xf32>
    %61 = vector.broadcast %60 : vector<1x128xf32> to vector<16x128xf32>
    %62 = arith.addf %59, %61 : vector<16x128xf32>
    %63 = arith.truncf %62 : vector<16x128xf32> to vector<16x128xbf16>
    %c0_31 = arith.constant 0 : index
    %c0_32 = arith.constant 0 : index
    %64 = vector.load %arg9[%c0_31, %c0_32] : memref<128x256xbf16, #tpu.memory_space<vmem>>, vector<128x256xbf16>
    %cst_33 = arith.constant dense<0.000000e+00> : vector<16x256xf32>
    %65 = tpu.matmul %63, %64, %cst_33 {dimension_numbers = #tpu.dot_dimension_numbers<[1], [0], [0], [1], [0, 0, 1, 1], [], []>} : vector<16x128xbf16>, vector<128x256xbf16>, vector<16x256xf32> -> vector<16x256xf32>
    %c0_34 = arith.constant 0 : index
    %c0_35 = arith.constant 0 : index
    %66 = vector.load %arg10[%c0_34, %c0_35] : memref<1x256xf32, #tpu.memory_space<vmem>>, vector<1x256xf32>
    %67 = vector.broadcast %66 : vector<1x256xf32> to vector<16x256xf32>
    %68 = arith.addf %65, %67 : vector<16x256xf32>
    %69 = vector.extract_strided_slice %68 {offsets = [0, 0], sizes = [8, 256], strides = [1, 1]} : vector<16x256xf32> to vector<8x256xf32>
    %cst_36 = arith.constant dense<0.000000e+00> : vector<256xf32>
    %70 = vector.multi_reduction <add>, %69, %cst_36 [0] : vector<8x256xf32> to vector<256xf32>
    %71 = vector.shape_cast %70 : vector<256xf32> to vector<1x256xf32>
    %cst_37 = arith.constant 8.000000e+00 : f32
    %72 = vector.broadcast %cst_37 : f32 to vector<1x256xf32>
    %73 = arith.divf %71, %72 : vector<1x256xf32>
    %74 = vector.broadcast %73 : vector<1x256xf32> to vector<8x256xf32>
    %75 = arith.subf %69, %74 : vector<8x256xf32>
    %76 = arith.mulf %75, %75 : vector<8x256xf32>
    %cst_38 = arith.constant dense<0.000000e+00> : vector<256xf32>
    %77 = vector.multi_reduction <add>, %76, %cst_38 [0] : vector<8x256xf32> to vector<256xf32>
    %78 = vector.shape_cast %77 : vector<256xf32> to vector<1x256xf32>
    %cst_39 = arith.constant 8.000000e+00 : f32
    %79 = vector.broadcast %cst_39 : f32 to vector<1x256xf32>
    %80 = arith.divf %78, %79 : vector<1x256xf32>
    %cst_40 = arith.constant 9.99999974E-6 : f32
    %81 = vector.broadcast %cst_40 : f32 to vector<1x256xf32>
    %82 = arith.addf %80, %81 : vector<1x256xf32>
    %83 = math.rsqrt %82 : vector<1x256xf32>
    %84 = vector.broadcast %83 : vector<1x256xf32> to vector<8x256xf32>
    %85 = arith.mulf %75, %84 : vector<8x256xf32>
    %86 = vector.extract_strided_slice %68 {offsets = [8, 0], sizes = [8, 256], strides = [1, 1]} : vector<16x256xf32> to vector<8x256xf32>
    %cst_41 = arith.constant dense<0.000000e+00> : vector<256xf32>
    %87 = vector.multi_reduction <add>, %86, %cst_41 [0] : vector<8x256xf32> to vector<256xf32>
    %88 = vector.shape_cast %87 : vector<256xf32> to vector<1x256xf32>
    %cst_42 = arith.constant 8.000000e+00 : f32
    %89 = vector.broadcast %cst_42 : f32 to vector<1x256xf32>
    %90 = arith.divf %88, %89 : vector<1x256xf32>
    %91 = vector.broadcast %90 : vector<1x256xf32> to vector<8x256xf32>
    %92 = arith.subf %86, %91 : vector<8x256xf32>
    %93 = arith.mulf %92, %92 : vector<8x256xf32>
    %cst_43 = arith.constant dense<0.000000e+00> : vector<256xf32>
    %94 = vector.multi_reduction <add>, %93, %cst_43 [0] : vector<8x256xf32> to vector<256xf32>
    %95 = vector.shape_cast %94 : vector<256xf32> to vector<1x256xf32>
    %cst_44 = arith.constant 8.000000e+00 : f32
    %96 = vector.broadcast %cst_44 : f32 to vector<1x256xf32>
    %97 = arith.divf %95, %96 : vector<1x256xf32>
    %cst_45 = arith.constant 9.99999974E-6 : f32
    %98 = vector.broadcast %cst_45 : f32 to vector<1x256xf32>
    %99 = arith.addf %97, %98 : vector<1x256xf32>
    %100 = math.rsqrt %99 : vector<1x256xf32>
    %101 = vector.broadcast %100 : vector<1x256xf32> to vector<8x256xf32>
    %102 = arith.mulf %92, %101 : vector<8x256xf32>
    %103 = tpu.concatenate %85, %102 in 0 : vector<8x256xf32>, vector<8x256xf32> -> vector<16x256xf32>
    %c0_46 = arith.constant 0 : index
    %c0_47 = arith.constant 0 : index
    %104 = vector.load %arg11[%c0_46, %c0_47] : memref<1x256xf32, #tpu.memory_space<vmem>>, vector<1x256xf32>
    %105 = vector.broadcast %104 : vector<1x256xf32> to vector<16x256xf32>
    %106 = arith.mulf %103, %105 : vector<16x256xf32>
    %c0_48 = arith.constant 0 : index
    %c0_49 = arith.constant 0 : index
    %107 = vector.load %arg12[%c0_48, %c0_49] : memref<1x256xf32, #tpu.memory_space<vmem>>, vector<1x256xf32>
    %108 = vector.broadcast %107 : vector<1x256xf32> to vector<16x256xf32>
    %109 = arith.addf %106, %108 : vector<16x256xf32>
    %cst_50 = arith.constant 0.000000e+00 : f32
    %110 = vector.broadcast %cst_50 : f32 to vector<16x256xf32>
    %111 = arith.maximumf %109, %110 : vector<16x256xf32>
    %112 = arith.truncf %111 : vector<16x256xf32> to vector<16x256xbf16>
    %c0_51 = arith.constant 0 : index
    %c0_52 = arith.constant 0 : index
    %113 = vector.load %arg13[%c0_51, %c0_52] : memref<256x128xbf16, #tpu.memory_space<vmem>>, vector<256x128xbf16>
    %cst_53 = arith.constant dense<0.000000e+00> : vector<16x128xf32>
    %114 = tpu.matmul %112, %113, %cst_53 {dimension_numbers = #tpu.dot_dimension_numbers<[1], [0], [0], [1], [0, 0, 1, 1], [], []>} : vector<16x256xbf16>, vector<256x128xbf16>, vector<16x128xf32> -> vector<16x128xf32>
    %c0_54 = arith.constant 0 : index
    %c0_55 = arith.constant 0 : index
    %115 = vector.load %arg14[%c0_54, %c0_55] : memref<1x128xf32, #tpu.memory_space<vmem>>, vector<1x128xf32>
    %116 = vector.broadcast %115 : vector<1x128xf32> to vector<16x128xf32>
    %117 = arith.addf %114, %116 : vector<16x128xf32>
    %118 = vector.extract_strided_slice %62 {offsets = [8, 0], sizes = [8, 128], strides = [1, 1]} : vector<16x128xf32> to vector<8x128xf32>
    %119 = vector.extract_strided_slice %62 {offsets = [0, 0], sizes = [8, 128], strides = [1, 1]} : vector<16x128xf32> to vector<8x128xf32>
    %120 = tpu.concatenate %118, %119 in 0 : vector<8x128xf32>, vector<8x128xf32> -> vector<16x128xf32>
    %121 = arith.mulf %117, %117 : vector<16x128xf32>
    %cst_56 = arith.constant dense<0.000000e+00> : vector<16xf32>
    %122 = vector.multi_reduction <add>, %121, %cst_56 [1] : vector<16x128xf32> to vector<16xf32>
    %123 = vector.shape_cast %122 : vector<16xf32> to vector<16x1xf32>
    %cst_57 = arith.constant 1.000000e-24 : f32
    %124 = vector.broadcast %cst_57 : f32 to vector<16x1xf32>
    %125 = arith.maximumf %123, %124 : vector<16x1xf32>
    %126 = math.rsqrt %125 : vector<16x1xf32>
    %127 = vector.broadcast %126 : vector<16x1xf32> to vector<16x128xf32>
    %128 = arith.mulf %117, %127 : vector<16x128xf32>
    %129 = arith.mulf %120, %120 : vector<16x128xf32>
    %cst_58 = arith.constant dense<0.000000e+00> : vector<16xf32>
    %130 = vector.multi_reduction <add>, %129, %cst_58 [1] : vector<16x128xf32> to vector<16xf32>
    %131 = vector.shape_cast %130 : vector<16xf32> to vector<16x1xf32>
    %cst_59 = arith.constant 1.000000e-24 : f32
    %132 = vector.broadcast %cst_59 : f32 to vector<16x1xf32>
    %133 = arith.maximumf %131, %132 : vector<16x1xf32>
    %134 = math.rsqrt %133 : vector<16x1xf32>
    %135 = vector.broadcast %134 : vector<16x1xf32> to vector<16x128xf32>
    %136 = arith.mulf %120, %135 : vector<16x128xf32>
    %137 = arith.mulf %128, %136 : vector<16x128xf32>
    %cst_60 = arith.constant dense<0.000000e+00> : vector<16xf32>
    %138 = vector.multi_reduction <add>, %137, %cst_60 [1] : vector<16x128xf32> to vector<16xf32>
    %139 = vector.shape_cast %138 : vector<16xf32> to vector<16x1xf32>
    %cst_61 = arith.constant dense<0.000000e+00> : vector<1xf32>
    %140 = vector.multi_reduction <add>, %139, %cst_61 [0] : vector<16x1xf32> to vector<1xf32>
    %141 = vector.shape_cast %140 : vector<1xf32> to vector<1x1xf32>
    %cst_62 = arith.constant 1.600000e+01 : f32
    %142 = vector.broadcast %cst_62 : f32 to vector<1x1xf32>
    %143 = arith.divf %141, %142 : vector<1x1xf32>
    %cst_63 = arith.constant 4.000000e+00 : f32
    %144 = vector.broadcast %cst_63 : f32 to vector<1x1xf32>
    %145 = arith.mulf %144, %143 : vector<1x1xf32>
    %cst_64 = arith.constant 4.000000e+00 : f32
    %146 = vector.broadcast %cst_64 : f32 to vector<1x1xf32>
    %147 = arith.subf %146, %145 : vector<1x1xf32>
    %c0_65 = arith.constant 0 : index
    %c0_66 = arith.constant 0 : index
    %148 = vector.load %arg15[%c0_65, %c0_66] : memref<1x1xf32, #tpu.memory_space<vmem>>, vector<1x1xf32>
    tpu.vector_store %arg15[%c0_65, %c0_66], %147 {strides = array<i32>} : memref<1x1xf32, #tpu.memory_space<vmem>>, vector<1x1xf32>,
    return
  }
}

</mosaic_0001>

<bundles_post_ra>
// kernel: byol_forward.1
= control target key start
LH: loop header
LB: loop body
LE: loop exit
PB: predicated region body
PF: predicated region fallthrough
CT: control target
= control target key end

     0   :  { %20 = vsyncpa [#allocation3], 0  ;;  %s3101_s0 = inlined_call_operand.vmem [shape: bf16[16,768], index: 0, kind: input, shape index: {}]   ;;  %s3102_s1 = inlined_call_operand.vmem [shape: bf16[768,256], index: 1, kind: input, shape index: {}]   ;;  %s3103_s2 = inlined_call_operand.vmem [shape: f32[1,256], index: 2, kind: input, shape index: {}]   ;;  %s3104_s3 = inlined_call_operand.vmem [shape: bf16[256,256], index: 3, kind: input, shape index: {}]   ;;  %s3105_s4 = inlined_call_operand.vmem [shape: f32[1,256], index: 4, kind: input, shape index: {}]   ;;  %s3106_s5 = inlined_call_operand.vmem [shape: f32[1,256], index: 5, kind: input, shape index: {}]   ;;  %s3107_s6 = inlined_call_operand.vmem [shape: f32[1,256], index: 6, kind: input, shape index: {}]   ;;  %s3108_s7 = inlined_call_operand.vmem [shape: bf16[256,128], index: 7, kind: input, shape index: {}]   ;;  %s3109_s8 = inlined_call_operand.vmem [shape: f32[1,128], index: 8, kind: input, shape index: {}]   ;;  %s3110_s9 = inlined_call_operand.vmem [shape: bf16[128,256], index: 9, kind: input, shape index: {}]   ;;  %s3111_s10 = inlined_call_operand.vmem [shape: f32[1,256], index: 10, kind: input, shape index: {}]   ;;  %s3112_s11 = inlined_call_operand.vmem [shape: f32[1,256], index: 11, kind: input, shape index: {}]   ;;  %s3113_s12 = inlined_call_operand.vmem [shape: f32[1,256], index: 12, kind: input, shape index: {}]   ;;  %s3114_s13 = inlined_call_operand.hbm [shape: bf16[256,128], index: 13, kind: input, shape index: {}]   ;;  %s3115_s14 = inlined_call_operand.vmem [shape: f32[1,128], index: 14, kind: input, shape index: {}]   ;;  %s3116_s15 = inlined_call_operand.hbm [shape: f32[1,1], index: 15, kind: output, shape index: {}]  }
   0x1   :  { %21 = vsyncpa [#allocation4], 0  ;;  %s2437_s18 = smov [#allocation2]   ;;  %s2389_s22 = scalar_lea.hbm %s3114_s13, 2048 }
   0x2   :  { %s53_s19 = sshll.u32 %s2437_s18, 4  ;;  %p2390_p0 = scmp.ne.s32.totalorder %s3114_s13, %s2389_s22  ;;  %s54_s19 = int_to_ptr.vmem [resolvable:$true] %s53_s19 }
   0x3   :  { %p2393_p1 = scmp.lt.u32.totalorder %s2389_s22, %s3114_s13 }
   0x5   :  { %p2395_p2 = pnand %p2393_p1, %p2390_p0 }
   0x7   :  { %2398 = shalt.err (!%p2395_p2)
}
   0x8   :  { %s2399_s27 = scalar_lea.vmem %s54_s19, 2048  ;;  %p2404_p4 = scmp.lt.s32.totalorder %s54_s19, %s54_s19 }
   0x9   :  { %p2400_p3 = scmp.ne.s32.totalorder %s54_s19, %s2399_s27  ;;  %p2405_p5 = scmp.lt.s32.totalorder %s2399_s27, %s2399_s27 }
   0xb   :  { %p2406_p6 = por %p2405_p5, %p2404_p4 }
   0xd   :  { %p2407_p7 = pnand %p2406_p6, %p2400_p3 }
   0xf   :  { %2410 = shalt.err (!%p2407_p7)
}
  0x10   :  { %s2438_s28 = smov 64   ;;  %s2439_s29 = smov 4  }
  0x11   :  { %59 = dma.hbm_to_vmem [thread:$0]  %s3114_s13, 2048, %s54_s19, [#allocation3], %s2438_s28, %s2438_s28, %s2439_s29  }
  0x12   :  { %2433 = dma.done.wait [#allocation3], 2048  }
  0x13   :  { %2434 = vsyncadd [#allocation3], 4294965248  ;;  %v2108_v0 = vld [vmem:[%s3102_s1 + $0x4] ss:$8 sps:$4 sm:$0xff]   ;;  %v2110_v1 = vld [vmem:[%s3102_s1] ss:$8 sps:$4 sm:$0xff]  }
  0x14   :  { %690 = vmatprep.subr.bf16.mxu0 %v2108_v0  ;;  %v2111_v2 = vld [vmem:[%s3102_s1 + $0x14] ss:$8 sps:$4 sm:$0xff]   ;;  %v2113_v3 = vld [vmem:[%s3102_s1 + $0x10] ss:$8 sps:$4 sm:$0xff]   ;;  %v2114_v4 = vld [vmem:[%s3102_s1 + $0x24] ss:$8 sps:$4 sm:$0xff]  }
  0x15   :  { %691 = vmatpush1.bf16.msra.mxu0 %v2110_v1  ;;  %v2116_v5 = vld [vmem:[%s3102_s1 + $0x20] ss:$8 sps:$4 sm:$0xff]   ;;  %v2117_v6 = vld [vmem:[%s3102_s1 + $0x34] ss:$8 sps:$4 sm:$0xff]   ;;  %v2119_v7 = vld [vmem:[%s3102_s1 + $0x30] ss:$8 sps:$4 sm:$0xff]  }
  0x16   :  { %692 = vmatprep.subr.bf16.mxu0 %v2111_v2  ;;  %v2120_v8 = vld [vmem:[%s3102_s1 + $0x44] ss:$8 sps:$4 sm:$0xff]   ;;  %v2122_v9 = vld [vmem:[%s3102_s1 + $0x40] ss:$8 sps:$4 sm:$0xff]   ;;  %v2123_v10 = vld [vmem:[%s3102_s1 + $0x54] ss:$8 sps:$4 sm:$0xff]  }
  0x17   :  { %v2125_v11 = vld [vmem:[%s3102_s1 + $0x50] ss:$8 sps:$4 sm:$0xff]   ;;  %v2126_v12 = vld [vmem:[%s3102_s1 + $0x64] ss:$8 sps:$4 sm:$0xff]   ;;  %v2128_v14 = vld [vmem:[%s3102_s1 + $0x60] ss:$8 sps:$4 sm:$0xff]  }
  0x18   :  { %v2158_v13 = vld [vmem:[%s3101_s0 + $0x4] ss:$24 sps:$4 sm:$0xff]   ;;  %v2131_v16 = vld [vmem:[%s3102_s1 + $0x70] ss:$8 sps:$4 sm:$0xff]   ;;  %v2134_v18 = vld [vmem:[%s3102_s1 + $0x80] ss:$8 sps:$4 sm:$0xff]  }
  0x19   :  { %693 = vmatpush1.bf16.msra.mxu0 %v2113_v3  ;;  %v2129_v15 = vld [vmem:[%s3102_s1 + $0x74] ss:$8 sps:$4 sm:$0xff]   ;;  %722 = vmatprep.mubr.bf16.mxu0 %v2158_v13  ;;  %v2132_v17 = vld [vmem:[%s3102_s1 + $0x84] ss:$8 sps:$4 sm:$0xff]   ;;  %v2137_v20 = vld [vmem:[%s3102_s1 + $0x90] ss:$8 sps:$4 sm:$0xff]  }
  0x1a   :  { %694 = vmatprep.subr.bf16.mxu0 %v2114_v4  ;;  %v2135_v19 = vld [vmem:[%s3102_s1 + $0x94] ss:$8 sps:$4 sm:$0xff]   ;;  %v2138_v21 = vld [vmem:[%s3102_s1 + $0xa4] ss:$8 sps:$4 sm:$0xff]   ;;  %v2140_v22 = vld [vmem:[%s3102_s1 + $0xa0] ss:$8 sps:$4 sm:$0xff]  }
  0x1b   :  { %v2141_v23 = vld [vmem:[%s3102_s1 + $0xb4] ss:$8 sps:$4 sm:$0xff]   ;;  %v2143_v24 = vld [vmem:[%s3102_s1 + $0xb0] ss:$8 sps:$4 sm:$0xff]   ;;  %v2144_v25 = vld [vmem:[%s3102_s1 + $0xc4] ss:$8 sps:$4 sm:$0xff]  }
  0x1c   :  { %v2146_v26 = vld [vmem:[%s3102_s1 + $0xc0] ss:$8 sps:$4 sm:$0xff]   ;;  %v2147_v27 = vld [vmem:[%s3102_s1 + $0xd4] ss:$8 sps:$4 sm:$0xff]   ;;  %v2149_v28 = vld [vmem:[%s3102_s1 + $0xd0] ss:$8 sps:$4 sm:$0xff]  }
  0x1d   :  { %695 = vmatpush1.bf16.msra.mxu0 %v2116_v5  ;;  %v2150_v29 = vld [vmem:[%s3102_s1 + $0xe4] ss:$8 sps:$4 sm:$0xff]   ;;  %v2152_v30 = vld [vmem:[%s3102_s1 + $0xe0] ss:$8 sps:$4 sm:$0xff]   ;;  %v2153_v31 = vld [vmem:[%s3102_s1 + $0xf4] ss:$8 sps:$4 sm:$0xff]  }
  0x1e   :  { %696 = vmatprep.subr.bf16.mxu0 %v2117_v6  ;;  %v2155_v32 = vld [vmem:[%s3102_s1 + $0xf0] ss:$8 sps:$4 sm:$0xff]   ;;  %v2161_v33 = vld [vmem:[%s3102_s1 + $0x104] ss:$8 sps:$4 sm:$0xff]   ;;  %v2159_v35 = vld [vmem:[%s3102_s1 + $0x100] ss:$8 sps:$4 sm:$0xff]  }
  0x1f   :  { %v2156_v34 = vld [vmem:[%s3101_s0] ss:$24 sps:$4 sm:$0xff]   ;;  %v2209_v36 = vld [vmem:[%s3101_s0 + $0xc] ss:$24 sps:$4 sm:$0xff]   ;;  %v2164_v37 = vld [vmem:[%s3102_s1 + $0x114] ss:$8 sps:$4 sm:$0xff]  }
  0x20   :  { %v2162_v38 = vld [vmem:[%s3102_s1 + $0x110] ss:$8 sps:$4 sm:$0xff]   ;;  %v2167_v39 = vld [vmem:[%s3102_s1 + $0x124] ss:$8 sps:$4 sm:$0xff]   ;;  %v2263_v41 = vld [vmem:[%s3104_s3] ss:$8 sps:$4 sm:$0xff]  }
  0x21   :  { %697 = vmatpush1.bf16.msra.mxu0 %v2119_v7  ;;  %v2261_v40 = vld [vmem:[%s3104_s3 + $0x4] ss:$8 sps:$4 sm:$0xff]   ;;  %v2165_v42 = vld [vmem:[%s3102_s1 + $0x120] ss:$8 sps:$4 sm:$0xff]   ;;  %v2264_v43 = vld [vmem:[%s3104_s3 + $0x14] ss:$8 sps:$4 sm:$0xff]  }
  0x22   :  { %698 = vmatprep.subr.bf16.mxu0 %v2120_v8  ;;  %1029 = vmatprep.subr.bf16.mxu1 %v2261_v40  ;;  %v2170_v44 = vld [vmem:[%s3102_s1 + $0x134] ss:$8 sps:$4 sm:$0xff]   ;;  %v2266_v45 = vld [vmem:[%s3104_s3 + $0x10] ss:$8 sps:$4 sm:$0xff]   ;;  %v2267_v46 = vld [vmem:[%s3104_s3 + $0x24] ss:$8 sps:$4 sm:$0xff]  }
  0x23   :  { %1030 = vmatpush1.bf16.msra.mxu1 %v2263_v41  ;;  %v2168_v47 = vld [vmem:[%s3102_s1 + $0x130] ss:$8 sps:$4 sm:$0xff]   ;;  %v2173_v48 = vld [vmem:[%s3102_s1 + $0x144] ss:$8 sps:$4 sm:$0xff]   ;;  %v2269_v49 = vld [vmem:[%s3104_s3 + $0x20] ss:$8 sps:$4 sm:$0xff]  }
  0x24   :  { %1031 = vmatprep.subr.bf16.mxu1 %v2264_v43  ;;  %v2270_v50 = vld [vmem:[%s3104_s3 + $0x34] ss:$8 sps:$4 sm:$0xff]   ;;  %v2171_v51 = vld [vmem:[%s3102_s1 + $0x140] ss:$8 sps:$4 sm:$0xff]   ;;  %v2272_v53 = vld [vmem:[%s3104_s3 + $0x30] ss:$8 sps:$4 sm:$0xff]  }
  0x25   :  { %699 = vmatpush1.bf16.msra.mxu0 %v2122_v9  ;;  %v2176_v52 = vld [vmem:[%s3102_s1 + $0x154] ss:$8 sps:$4 sm:$0xff]   ;;  %v2273_v54 = vld [vmem:[%s3104_s3 + $0x44] ss:$8 sps:$4 sm:$0xff]   ;;  %v2174_v55 = vld [vmem:[%s3102_s1 + $0x150] ss:$8 sps:$4 sm:$0xff]  }
  0x26   :  { %700 = vmatprep.subr.bf16.mxu0 %v2123_v10  ;;  %v2179_v56 = vld [vmem:[%s3102_s1 + $0x164] ss:$8 sps:$4 sm:$0xff]   ;;  %v2275_v57 = vld [vmem:[%s3104_s3 + $0x40] ss:$8 sps:$4 sm:$0xff]   ;;  %v2276_v58 = vld [vmem:[%s3104_s3 + $0x54] ss:$8 sps:$4 sm:$0xff]  }
  0x27   :  { %1032 = vmatpush1.bf16.msra.mxu1 %v2266_v45  ;;  %v2177_v59 = vld [vmem:[%s3102_s1 + $0x160] ss:$8 sps:$4 sm:$0xff]   ;;  %v2182_v60 = vld [vmem:[%s3102_s1 + $0x174] ss:$8 sps:$4 sm:$0xff]   ;;  %v2278_v61 = vld [vmem:[%s3104_s3 + $0x50] ss:$8 sps:$4 sm:$0xff]  }
  0x28   :  { %1033 = vmatprep.subr.bf16.mxu1 %v2267_v46  ;;  %v2279_v62 = vld [vmem:[%s3104_s3 + $0x64] ss:$8 sps:$4 sm:$0xff]   ;;  %v2180_v63 = vld [vmem:[%s3102_s1 + $0x170] ss:$8 sps:$4 sm:$0xff]   ;;  %v2281_v0 = vld [vmem:[%s3104_s3 + $0x60] ss:$8 sps:$4 sm:$0xff]  }
  0x29   :  { %701 = vmatpush1.bf16.msra.mxu0 %v2125_v11  ;;  %v2185_v1 = vld [vmem:[%s3102_s1 + $0x184] ss:$8 sps:$4 sm:$0xff]   ;;  %v2282_v2 = vld [vmem:[%s3104_s3 + $0x74] ss:$8 sps:$4 sm:$0xff]   ;;  %v2183_v3 = vld [vmem:[%s3102_s1 + $0x180] ss:$8 sps:$4 sm:$0xff]  }
  0x2a   :  { %702 = vmatprep.subr.bf16.mxu0 %v2126_v12  ;;  %v2284_v4 = vld [vmem:[%s3104_s3 + $0x70] ss:$8 sps:$4 sm:$0xff]   ;;  %v2188_v5 = vld [vmem:[%s3102_s1 + $0x194] ss:$8 sps:$4 sm:$0xff]   ;;  %v2285_v6 = vld [vmem:[%s3104_s3 + $0x84] ss:$8 sps:$4 sm:$0xff]  }
  0x2b   :  { %1034 = vmatpush1.bf16.msra.mxu1 %v2269_v49  ;;  %v2186_v7 = vld [vmem:[%s3102_s1 + $0x190] ss:$8 sps:$4 sm:$0xff]   ;;  %v2287_v8 = vld [vmem:[%s3104_s3 + $0x80] ss:$8 sps:$4 sm:$0xff]   ;;  %v2191_v9 = vld [vmem:[%s3102_s1 + $0x1a4] ss:$8 sps:$4 sm:$0xff]  }
  0x2c   :  { %1035 = vmatprep.subr.bf16.mxu1 %v2270_v50  ;;  %v2288_v10 = vld [vmem:[%s3104_s3 + $0x94] ss:$8 sps:$4 sm:$0xff]   ;;  %v2189_v11 = vld [vmem:[%s3102_s1 + $0x1a0] ss:$8 sps:$4 sm:$0xff]   ;;  %v2290_v12 = vld [vmem:[%s3104_s3 + $0x90] ss:$8 sps:$4 sm:$0xff]  }
  0x2d   :  { %703 = vmatpush1.bf16.msra.mxu0 %v2128_v14  ;;  %v2194_v13 = vld [vmem:[%s3102_s1 + $0x1b4] ss:$8 sps:$4 sm:$0xff]   ;;  %v2291_v14 = vld [vmem:[%s3104_s3 + $0xa4] ss:$8 sps:$4 sm:$0xff]   ;;  %v2222_v41 = vld [vmem:[%s3102_s1 + $0x240] ss:$8 sps:$4 sm:$0xff]  }
  0x2e   :  { %704 = vmatprep.subr.bf16.mxu0 %v2129_v15  ;;  %v2192_v15 = vld [vmem:[%s3102_s1 + $0x1b0] ss:$8 sps:$4 sm:$0xff]   ;;  %v2224_v40 = vld [vmem:[%s3102_s1 + $0x244] ss:$8 sps:$4 sm:$0xff]   ;;  %v2228_v45 = vld [vmem:[%s3102_s1 + $0x260] ss:$8 sps:$4 sm:$0xff]  }
  0x2f   :  { %1036 = vmatpush1.bf16.msra.mxu1 %v2272_v53  ;;  %v2225_v43 = vld [vmem:[%s3102_s1 + $0x250] ss:$8 sps:$4 sm:$0xff]   ;;  %v2233_v46 = vld [vmem:[%s3102_s1 + $0x274] ss:$8 sps:$4 sm:$0xff]   ;;  %v2234_v49 = vld [vmem:[%s3102_s1 + $0x280] ss:$8 sps:$4 sm:$0xff]  }
  0x30   :  { %1037 = vmatprep.subr.bf16.mxu1 %v2273_v54  ;;  %v2239_v50 = vld [vmem:[%s3102_s1 + $0x294] ss:$8 sps:$4 sm:$0xff]   ;;  %v2240_v53 = vld [vmem:[%s3102_s1 + $0x2a0] ss:$8 sps:$4 sm:$0xff]   ;;  %vm1846_vm0 = vcmask 0  }
  0x31   :  { %705 = vmatpush1.bf16.msra.mxu0 %v2131_v16  ;;  %v2293_v16 = vld [vmem:[%s3104_s3 + $0xa0] ss:$8 sps:$4 sm:$0xff]   ;;  %v2245_v54 = vld [vmem:[%s3102_s1 + $0x2b4] ss:$8 sps:$4 sm:$0xff]  }
  0x32   :  { %706 = vmatprep.subr.bf16.mxu0 %v2132_v17  ;;  %v2197_v17 = vld [vmem:[%s3102_s1 + $0x1c4] ss:$8 sps:$4 sm:$0xff]  }
  0x33   :  { %1038 = vmatpush1.bf16.msra.mxu1 %v2275_v57  ;;  %v2246_v57 = vld [vmem:[%s3102_s1 + $0x2c0] ss:$8 sps:$4 sm:$0xff]  }
  0x34   :  { %1039 = vmatprep.subr.bf16.mxu1 %v2276_v58  ;;  %v2251_v58 = vld [vmem:[%s3102_s1 + $0x2d4] ss:$8 sps:$4 sm:$0xff]  }
  0x35   :  { %707 = vmatpush1.bf16.msra.mxu0 %v2134_v18  ;;  %v2294_v18 = vld [vmem:[%s3104_s3 + $0xb4] ss:$8 sps:$4 sm:$0xff]  }
  0x36   :  { %708 = vmatprep.subr.bf16.mxu0 %v2135_v19  ;;  %v2195_v19 = vld [vmem:[%s3102_s1 + $0x1c0] ss:$8 sps:$4 sm:$0xff]  }
  0x37   :  { %1040 = vmatpush1.bf16.msra.mxu1 %v2278_v61  ;;  %v2252_v61 = vld [vmem:[%s3102_s1 + $0x2e0] ss:$8 sps:$4 sm:$0xff]  }
  0x38   :  { %1041 = vmatprep.subr.bf16.mxu1 %v2279_v62  ;;  %v2257_v62 = vld [vmem:[%s3102_s1 + $0x2f4] ss:$8 sps:$4 sm:$0xff]  }
  0x39   :  { %709 = vmatpush1.bf16.msra.mxu0 %v2137_v20  ;;  %v2296_v20 = vld [vmem:[%s3104_s3 + $0xb0] ss:$8 sps:$4 sm:$0xff]  }
  0x3a   :  { %710 = vmatprep.subr.bf16.mxu0 %v2138_v21  ;;  %v2200_v21 = vld [vmem:[%s3102_s1 + $0x1d4] ss:$8 sps:$4 sm:$0xff]  }
  0x3b   :  { %1042 = vmatpush1.bf16.msra.mxu1 %v2281_v0  ;;  %v2258_v0 = vld [vmem:[%s3101_s0 + $0x10] ss:$24 sps:$4 sm:$0xff]  }
  0x3c   :  { %1043 = vmatprep.subr.bf16.mxu1 %v2282_v2  ;;  %v2303_v2 = vld [vmem:[%s3104_s3 + $0xe4] ss:$8 sps:$4 sm:$0xff]  }
  0x3d   :  { %711 = vmatpush1.bf16.msra.mxu0 %v2140_v22  ;;  %v2297_v22 = vld [vmem:[%s3104_s3 + $0xc4] ss:$8 sps:$4 sm:$0xff]  }
  0x3e   :  { %712 = vmatprep.subr.bf16.mxu0 %v2141_v23  ;;  %v2198_v23 = vld [vmem:[%s3102_s1 + $0x1d0] ss:$8 sps:$4 sm:$0xff]  }
  0x3f   :  { %1044 = vmatpush1.bf16.msra.mxu1 %v2284_v4  ;;  %v2306_v4 = vld [vmem:[%s3104_s3 + $0xf4] ss:$8 sps:$4 sm:$0xff]  }
  0x40   :  { %1045 = vmatprep.subr.bf16.mxu1 %v2285_v6  ;;  %v170_v6 = vlaneseq }
  0x41   :  { %713 = vmatpush1.bf16.msra.mxu0 %v2143_v24  ;;  %v2299_v24 = vld [vmem:[%s3104_s3 + $0xc0] ss:$8 sps:$4 sm:$0xff]  }
  0x42   :  { %714 = vmatprep.subr.bf16.mxu0 %v2144_v25  ;;  %v2203_v25 = vld [vmem:[%s3102_s1 + $0x1e4] ss:$8 sps:$4 sm:$0xff]  }
  0x43   :  { %1046 = vmatpush1.bf16.msra.mxu1 %v2287_v8 }
  0x44   :  { %1047 = vmatprep.subr.bf16.mxu1 %v2288_v10 }
  0x45   :  { %715 = vmatpush1.bf16.msra.mxu0 %v2146_v26  ;;  %v2300_v26 = vld [vmem:[%s3104_s3 + $0xd4] ss:$8 sps:$4 sm:$0xff]  }
  0x46   :  { %716 = vmatprep.subr.bf16.mxu0 %v2147_v27  ;;  %v2201_v27 = vld [vmem:[%s3102_s1 + $0x1e0] ss:$8 sps:$4 sm:$0xff]  }
  0x47   :  { %1048 = vmatpush1.bf16.msra.mxu1 %v2290_v12 }
  0x48   :  { %1049 = vmatprep.subr.bf16.mxu1 %v2291_v14 }
  0x49   :  { %717 = vmatpush1.bf16.msra.mxu0 %v2149_v28  ;;  %v2206_v28 = vld [vmem:[%s3102_s1 + $0x1f4] ss:$8 sps:$4 sm:$0xff]  }
  0x4a   :  { %718 = vmatprep.subr.bf16.mxu0 %v2150_v29  ;;  %v2204_v29 = vld [vmem:[%s3102_s1 + $0x1f0] ss:$8 sps:$4 sm:$0xff]  }
  0x4b   :  { %1050 = vmatpush1.bf16.msra.mxu1 %v2293_v16 }
  0x4c   :  { %1051 = vmatprep.subr.bf16.mxu1 %v2294_v18 }
  0x4d   :  { %719 = vmatpush1.bf16.msra.mxu0 %v2152_v30  ;;  %v2212_v30 = vld [vmem:[%s3102_s1 + $0x204] ss:$8 sps:$4 sm:$0xff]  }
  0x4e   :  { %720 = vmatprep.subr.bf16.mxu0 %v2153_v31  ;;  %v2207_v31 = vld [vmem:[%s3101_s0 + $0x8] ss:$24 sps:$4 sm:$0xff]  }
  0x4f   :  { %1052 = vmatpush1.bf16.msra.mxu1 %v2296_v20 }
  0x50   :  { %1053 = vmatprep.subr.bf16.mxu1 %v2297_v22 }
  0x51   :  { %721 = vmatpush1.bf16.msra.mxu0 %v2155_v32  ;;  %v2210_v32 = vld [vmem:[%s3102_s1 + $0x200] ss:$8 sps:$4 sm:$0xff]  }
  0x52   :  { %733 = vmatprep.subr.bf16.mxu0 %v2161_v33  ;;  %v2260_v33 = vld [vmem:[%s3101_s0 + $0x14] ss:$24 sps:$4 sm:$0xff]  }
  0x53   :  { %1054 = vmatpush1.bf16.msra.mxu1 %v2299_v24 }
  0x54   :  { %723 = vmatmul.mubr.bf16.vlgmr.msra.gmra.mrb[0].mxu0 %v2156_v34  ;;  %1055 = vmatprep.subr.bf16.mxu1 %v2300_v26  ;;  %v2215_v34 = vld [vmem:[%s3102_s1 + $0x214] ss:$8 sps:$4 sm:$0xff]  }
  0x55   :  { %734 = vmatpush1.bf16.msra.mxu0 %v2159_v35  ;;  %765 = vmatprep.mubr.bf16.mxu0 %v2209_v36  ;;  %v2213_v35 = vld [vmem:[%s3102_s1 + $0x210] ss:$8 sps:$4 sm:$0xff]   ;;  %v2218_v36 = vld [vmem:[%s3102_s1 + $0x224] ss:$8 sps:$4 sm:$0xff]  }
  0x56   :  { %735 = vmatprep.subr.bf16.mxu0 %v2164_v37  ;;  %v2216_v37 = vld [vmem:[%s3102_s1 + $0x220] ss:$8 sps:$4 sm:$0xff]  }
  0x59   :  { %736 = vmatpush1.bf16.msra.mxu0 %v2162_v38  ;;  %v2221_v38 = vld [vmem:[%s3102_s1 + $0x234] ss:$8 sps:$4 sm:$0xff]  }
  0x5a   :  { %737 = vmatprep.subr.bf16.mxu0 %v2167_v39  ;;  %v2219_v39 = vld [vmem:[%s3102_s1 + $0x230] ss:$8 sps:$4 sm:$0xff]  }
  0x5d   :  { %738 = vmatpush1.bf16.msra.mxu0 %v2165_v42  ;;  %v2227_v42 = vld [vmem:[%s3102_s1 + $0x254] ss:$8 sps:$4 sm:$0xff]  }
  0x5e   :  { %739 = vmatprep.subr.bf16.mxu0 %v2170_v44  ;;  %v2230_v44 = vld [vmem:[%s3102_s1 + $0x264] ss:$8 sps:$4 sm:$0xff]  }
  0x61   :  { %740 = vmatpush1.bf16.msra.mxu0 %v2168_v47  ;;  %v2231_v47 = vld [vmem:[%s3102_s1 + $0x270] ss:$8 sps:$4 sm:$0xff]  }
  0x62   :  { %741 = vmatprep.subr.bf16.mxu0 %v2173_v48  ;;  %v2236_v48 = vld [vmem:[%s3102_s1 + $0x284] ss:$8 sps:$4 sm:$0xff]  }
  0x65   :  { %742 = vmatpush1.bf16.msra.mxu0 %v2171_v51  ;;  %v2237_v51 = vld [vmem:[%s3102_s1 + $0x290] ss:$8 sps:$4 sm:$0xff]  }
  0x66   :  { %743 = vmatprep.subr.bf16.mxu0 %v2176_v52  ;;  %v2242_v52 = vld [vmem:[%s3102_s1 + $0x2a4] ss:$8 sps:$4 sm:$0xff]  }
  0x69   :  { %744 = vmatpush1.bf16.msra.mxu0 %v2174_v55  ;;  %v2243_v55 = vld [vmem:[%s3102_s1 + $0x2b0] ss:$8 sps:$4 sm:$0xff]  }
  0x6a   :  { %745 = vmatprep.subr.bf16.mxu0 %v2179_v56  ;;  %v2248_v56 = vld [vmem:[%s3102_s1 + $0x2c4] ss:$8 sps:$4 sm:$0xff]  }
  0x6d   :  { %746 = vmatpush1.bf16.msra.mxu0 %v2177_v59  ;;  %v2249_v59 = vld [vmem:[%s3102_s1 + $0x2d0] ss:$8 sps:$4 sm:$0xff]  }
  0x6e   :  { %747 = vmatprep.subr.bf16.mxu0 %v2182_v60  ;;  %v2254_v60 = vld [vmem:[%s3102_s1 + $0x2e4] ss:$8 sps:$4 sm:$0xff]  }
  0x71   :  { %748 = vmatpush1.bf16.msra.mxu0 %v2180_v63  ;;  %v2255_v63 = vld [vmem:[%s3102_s1 + $0x2f0] ss:$8 sps:$4 sm:$0xff]  }
  0x72   :  { %749 = vmatprep.subr.bf16.mxu0 %v2185_v1  ;;  %v2302_v1 = vld [vmem:[%s3104_s3 + $0xd0] ss:$8 sps:$4 sm:$0xff]  }
  0x73   :  { %1056 = vmatpush1.bf16.msra.mxu1 %v2302_v1 }
  0x74   :  { %1057 = vmatprep.subr.bf16.mxu1 %v2303_v2 }
  0x75   :  { %750 = vmatpush1.bf16.msra.mxu0 %v2183_v3  ;;  %v2305_v3 = vld [vmem:[%s3104_s3 + $0xe0] ss:$8 sps:$4 sm:$0xff]  }
  0x76   :  { %751 = vmatprep.subr.bf16.mxu0 %v2188_v5  ;;  %v2308_v5 = vld [vmem:[%s3104_s3 + $0xf0] ss:$8 sps:$4 sm:$0xff]  }
  0x77   :  { %1058 = vmatpush1.bf16.msra.mxu1 %v2305_v3 }
  0x78   :  { %1059 = vmatprep.subr.bf16.mxu1 %v2306_v4 }
  0x79   :  { %752 = vmatpush1.bf16.msra.mxu0 %v2186_v7  ;;  %v171_v7 = vshrl.u32 %v170_v6, 7 }
  0x7a   :  { %753 = vmatprep.subr.bf16.mxu0 %v2191_v9  ;;  %v168_v9 = vld [vmem:[%s3103_s2] sm:$0x3] }
  0x7b   :  { %1060 = vmatpush1.bf16.msra.mxu1 %v2308_v5  ;;  %v2936_v8 = vsub.s32 0, %v171_v7  ;;  %v2941_v10 = vsub.s32 1, %v171_v7 }
  0x7d   :  { %754 = vmatpush1.bf16.msra.mxu0 %v2189_v11  ;;  %v173_v11 = vrot.slane %v168_v9, %v2936_v8  ;;  %v177_v12 = vrot.slane %v168_v9, %v2941_v10 }
  0x7e   :  { %755 = vmatprep.subr.bf16.mxu0 %v2194_v13 }
  0x81   :  { %756 = vmatpush1.bf16.msra.mxu0 %v2192_v15 }
  0x82   :  { %757 = vmatprep.subr.bf16.mxu0 %v2197_v17 }
  0x85   :  { %758 = vmatpush1.bf16.msra.mxu0 %v2195_v19 }
  0x86   :  { %759 = vmatprep.subr.bf16.mxu0 %v2200_v21 }
  0x89   :  { %760 = vmatpush1.bf16.msra.mxu0 %v2198_v23 }
  0x8a   :  { %761 = vmatprep.subr.bf16.mxu0 %v2203_v25 }
  0x8d   :  { %762 = vmatpush1.bf16.msra.mxu0 %v2201_v27  ;;  %v2309_v27 = vld [vmem:[%s3108_s7 + $0x40] sm:$0xff]  }
  0x8e   :  { %763 = vmatprep.subr.bf16.mxu0 %v2206_v28  ;;  %v2310_v28 = vld [vmem:[%s3108_s7] sm:$0xff]   ;;  %2047 = vmatprep.subr.bf16.mxu1 %v2309_v27 }
  0x91   :  { %764 = vmatpush1.bf16.msra.mxu0 %v2204_v29  ;;  %v2311_v29 = vld [vmem:[%s3108_s7 + $0x48] sm:$0xff]  }
  0x92   :  { %776 = vmatprep.subr.bf16.mxu0 %v2212_v30  ;;  %v2312_v30 = vld [vmem:[%s3108_s7 + $0x8] sm:$0xff]  }
  0x94   :  { %766 = vmatmul.mubr.bf16.vlgmr.msra.gmra.mrb[0].mxu0 %v2207_v31  ;;  %v2313_v31 = vld [vmem:[%s3108_s7 + $0x50] sm:$0xff]  }
  0x95   :  { %777 = vmatpush1.bf16.msra.mxu0 %v2210_v32  ;;  %808 = vmatprep.mubr.bf16.mxu0 %v2260_v33  ;;  %v2314_v32 = vld [vmem:[%s3108_s7 + $0x10] sm:$0xff]   ;;  %v2315_v33 = vld [vmem:[%s3108_s7 + $0x58] sm:$0xff]  }
  0x96   :  { %778 = vmatprep.subr.bf16.mxu0 %v2215_v34  ;;  %v2316_v34 = vld [vmem:[%s3108_s7 + $0x18] sm:$0xff]  }
  0x99   :  { %779 = vmatpush1.bf16.msra.mxu0 %v2213_v35  ;;  %v2317_v35 = vld [vmem:[%s3108_s7 + $0x60] sm:$0xff]  }
  0x9a   :  { %780 = vmatprep.subr.bf16.mxu0 %v2218_v36  ;;  %v2318_v36 = vld [vmem:[%s3108_s7 + $0x20] sm:$0xff]  }
  0x9d   :  { %781 = vmatpush1.bf16.msra.mxu0 %v2216_v37  ;;  %v2319_v37 = vld [vmem:[%s3108_s7 + $0x68] sm:$0xff]  }
  0x9e   :  { %782 = vmatprep.subr.bf16.mxu0 %v2221_v38  ;;  %v2320_v38 = vld [vmem:[%s3108_s7 + $0x28] sm:$0xff]  }
  0xa1   :  { %783 = vmatpush1.bf16.msra.mxu0 %v2219_v39  ;;  %v2321_v39 = vld [vmem:[%s3108_s7 + $0x70] sm:$0xff]  }
  0xa2   :  { %784 = vmatprep.subr.bf16.mxu0 %v2224_v40  ;;  %v2322_v40 = vld [vmem:[%s3108_s7 + $0x30] sm:$0xff]  }
  0xa5   :  { %785 = vmatpush1.bf16.msra.mxu0 %v2222_v41  ;;  %v2323_v41 = vld [vmem:[%s3108_s7 + $0x78] sm:$0xff]  }
  0xa6   :  { %786 = vmatprep.subr.bf16.mxu0 %v2227_v42  ;;  %v2324_v42 = vld [vmem:[%s3108_s7 + $0x38] sm:$0xff]  }
  0xa9   :  { %787 = vmatpush1.bf16.msra.mxu0 %v2225_v43  ;;  %v2327_v43 = vld [vmem:[%s3110_s9 + $0x4] ss:$8 sps:$4 sm:$0xff]  }
  0xaa   :  { %788 = vmatprep.subr.bf16.mxu0 %v2230_v44  ;;  %v857_v44 = vld [vmem:[%s3105_s4] sm:$0x3] }
  0xad   :  { %789 = vmatpush1.bf16.msra.mxu0 %v2228_v45  ;;  %v862_v45 = vrot.slane %v857_v44, %v2936_v8 }
  0xae   :  { %790 = vmatprep.subr.bf16.mxu0 %v2233_v46  ;;  %v866_v46 = vrot.slane %v857_v44, %v2941_v10 }
  0xb1   :  { %791 = vmatpush1.bf16.msra.mxu0 %v2231_v47 }
  0xb2   :  { %792 = vmatprep.subr.bf16.mxu0 %v2236_v48 }
  0xb5   :  { %793 = vmatpush1.bf16.msra.mxu0 %v2234_v49 }
  0xb6   :  { %794 = vmatprep.subr.bf16.mxu0 %v2239_v50 }
  0xb9   :  { %795 = vmatpush1.bf16.msra.mxu0 %v2237_v51 }
  0xba   :  { %796 = vmatprep.subr.bf16.mxu0 %v2242_v52 }
  0xbd   :  { %797 = vmatpush1.bf16.msra.mxu0 %v2240_v53 }
  0xbe   :  { %798 = vmatprep.subr.bf16.mxu0 %v2245_v54 }
  0xc1   :  { %799 = vmatpush1.bf16.msra.mxu0 %v2243_v55 }
  0xc2   :  { %800 = vmatprep.subr.bf16.mxu0 %v2248_v56 }
  0xc5   :  { %801 = vmatpush1.bf16.msra.mxu0 %v2246_v57 }
  0xc6   :  { %802 = vmatprep.subr.bf16.mxu0 %v2251_v58 }
  0xc9   :  { %803 = vmatpush1.bf16.msra.mxu0 %v2249_v59 }
  0xca   :  { %804 = vmatprep.subr.bf16.mxu0 %v2254_v60 }
  0xcd   :  { %805 = vmatpush1.bf16.msra.mxu0 %v2252_v61 }
  0xce   :  { %806 = vmatprep.subr.bf16.mxu0 %v2257_v62 }
  0xd1   :  { %807 = vmatpush1.bf16.msra.mxu0 %v2255_v63 }
  0xd4   :  { %809 = vmatmul.mubr.bf16.vlgmr.msra.gmra.mrb[0].mxu0 %v2258_v0 }
 0x1a7   :  { %v810_v13 = vpop.f32.mrb[0].mxu0 }
 0x1a8   :  { %v2091_v14 = vadd.f32 %v810_v13, %v173_v11  ;;  %v812_v15 = vpop.f32.mrb[1].mxu0 }
 0x1a9   :  { %v2092_v16 = vadd.f32 %v812_v15, %v177_v12  ;;  %v814_v17 = vpop.f32.mrb[2].mxu0 }
 0x1aa   :  { %v2093_v18 = vadd.f32 %v814_v17, %v173_v11  ;;  %v816_v19 = vpop.f32.mrb[3].mxu0  ;;  %v819_v21 = vmax.f32 %v2091_v14, 0.0 }
 0x1ab   :  { %v2094_v20 = vadd.f32 %v816_v19, %v177_v12  ;;  %v820_v23 = vmax.f32 %v2092_v16, 0.0 }
 0x1ac   :  { %v821_v22 = vmax.f32 %v2093_v18, 0.0 }
 0x1ad   :  { %v822_v24 = vmax.f32 %v2094_v20, 0.0 }
 0x1ae   :  { %v823_v25 = vpack.c.bf16 %v821_v22, %v819_v21 }
 0x1af   :  { %v824_v26 = vpack.c.bf16 %v822_v24, %v820_v23 }
 0x1b1   :  { %1061 = vmatprep.mubr.bf16.mxu1 %v824_v26 }
 0x1b2   :  { %1062 = vmatmul.mubr.bf16.vlgmr.msra.gmra.mrb[0].mxu1 %v823_v25 }
 0x1b3   :  { %2048 = vmatpush3.bf16.msra.mxu1 %v2310_v28 }
 0x1b4   :  { %2049 = vmatprep.subr.bf16.mxu1 %v2311_v29 }
 0x1b7   :  { %2050 = vmatpush3.bf16.msra.mxu1 %v2312_v30 }
 0x1b8   :  { %2051 = vmatprep.subr.bf16.mxu1 %v2313_v31 }
 0x1bb   :  { %2052 = vmatpush3.bf16.msra.mxu1 %v2314_v32 }
 0x1bc   :  { %2053 = vmatprep.subr.bf16.mxu1 %v2315_v33 }
 0x1bf   :  { %2054 = vmatpush3.bf16.msra.mxu1 %v2316_v34 }
 0x1c0   :  { %2055 = vmatprep.subr.bf16.mxu1 %v2317_v35 }
 0x1c3   :  { %2056 = vmatpush3.bf16.msra.mxu1 %v2318_v36 }
 0x1c4   :  { %2057 = vmatprep.subr.bf16.mxu1 %v2319_v37 }
 0x1c7   :  { %2058 = vmatpush3.bf16.msra.mxu1 %v2320_v38 }
 0x1c8   :  { %2059 = vmatprep.subr.bf16.mxu1 %v2321_v39 }
 0x1cb   :  { %2060 = vmatpush3.bf16.msra.mxu1 %v2322_v40 }
 0x1cc   :  { %2061 = vmatprep.subr.bf16.mxu1 %v2323_v41 }
 0x1cf   :  { %2062 = vmatpush3.bf16.msra.mxu1 %v2324_v42 }
 0x1d0   :  { %1472 = vmatprep.subr.bf16.mxu1 %v2327_v43 }
 0x285   :  { %v1063_v47 = vpop.f32.mrb[0].mxu1 }
 0x286   :  { %v1064_v48 = vadd.f32 %v1063_v47, %v862_v45  ;;  %v1065_v49 = vpop.f32.mrb[1].mxu1 }
 0x287   :  { %v1066_v50 = vadd.f32 %v1065_v49, %v866_v46  ;;  %v1067_v51 = vpop.f32.mrb[2].mxu1 }
 0x288   :  { %v1072_v52 = vrot.slane %v1064_v48, 4  ;;  %v1068_v53 = vadd.f32 %v1067_v51, %v862_v45  ;;  %v1069_v54 = vpop.f32.mrb[3].mxu1 }
 0x289   :  { %v1078_v55 = vrot.slane %v1066_v50, 4  ;;  %v1070_v56 = vadd.f32 %v1069_v54, %v866_v46 }
 0x28a   :  { %v1073_v57 = vadd.f32 %v1072_v52, %v1064_v48  ;;  %v1111_v58 = vrot.slane %v1068_v53, 4 }
 0x28b   :  { %v1079_v59 = vadd.f32 %v1078_v55, %v1066_v50  ;;  %v1117_v60 = vrot.slane %v1070_v56, 4 }
 0x28c   :  { %v1074_v61 = vrot.slane %v1073_v57, 2  ;;  %v1112_v62 = vadd.f32 %v1111_v58, %v1068_v53 }
 0x28d   :  { %v1080_v63 = vrot.slane %v1079_v59, 2  ;;  %v1118_v0 = vadd.f32 %v1117_v60, %v1070_v56 }
 0x28e   :  { %v1075_v1 = vadd.f32 %v1074_v61, %v1073_v57  ;;  %v1113_v2 = vrot.slane %v1112_v62, 2  ;;  %v1149_v61 = vld [vmem:[%s3106_s5] sm:$0x3] }
 0x28f   :  { %v1081_v3 = vadd.f32 %v1080_v63, %v1079_v59  ;;  %v1119_v4 = vrot.slane %v1118_v0, 2  ;;  %v1154_v63 = vrot.slane %v1149_v61, %v2936_v8 }
 0x290   :  { %v1076_v5 = vrot.slane %v1075_v1, 1  ;;  %v1114_v6 = vadd.f32 %v1113_v2, %v1112_v62  ;;  %v1165_v62 = vld [vmem:[%s3107_s6] sm:$0x3] }
 0x291   :  { %v1082_v7 = vrot.slane %v1081_v3, 1  ;;  %v1120_v9 = vadd.f32 %v1119_v4, %v1118_v0  ;;  %v1170_v4 = vrot.slane %v1165_v62, %v2936_v8 }
 0x292   :  { %v1077_v11 = vadd.f32 %v1076_v5, %v1075_v1  ;;  %v1115_v12 = vrot.slane %v1114_v6, 1  ;;  %v1158_v1 = vrot.slane %v1149_v61, %v2941_v10  ;;  %v2355_v61 = vld [vmem:[#allocation2 + $0x58] sm:$0xff]  }
 0x293   :  { %v1083_v13 = vadd.f32 %v1082_v7, %v1081_v3  ;;  %v1121_v14 = vrot.slane %v1120_v9, 1  ;;  %v1174_v7 = vrot.slane %v1165_v62, %v2941_v10  ;;  %v2356_v62 = vld [vmem:[#allocation2 + $0x18] sm:$0xff]  }
 0x294   :  { %v1085_v15 = vmul.f32 0.125, %v1077_v11  ;;  %v1116_v16 = vadd.f32 %v1115_v12, %v1114_v6 }
 0x295   :  { %v1086_v17 = vmul.f32 0.125, %v1083_v13  ;;  %v1122_v18 = vadd.f32 %v1121_v14, %v1120_v9 }
 0x296   :  { %v1087_v19 = vsub.f32 %v1064_v48, %v1085_v15  ;;  %v1123_v20 = vmul.f32 0.125, %v1116_v16 }
 0x297   :  { %v1088_v21 = vsub.f32 %v1066_v50, %v1086_v17  ;;  %v1124_v22 = vmul.f32 0.125, %v1122_v18 }
 0x298   :  { %v1089_v23 = vmul.f32 %v1087_v19, %v1087_v19  ;;  %v1125_v24 = vsub.f32 %v1068_v53, %v1123_v20 }
 0x299   :  { %v1090_v25 = vmul.f32 %v1088_v21, %v1088_v21  ;;  %v1126_v26 = vsub.f32 %v1070_v56, %v1124_v22 }
 0x29a   :  { %v1091_v27 = vrot.slane %v1089_v23, 4  ;;  %v1127_v28 = vmul.f32 %v1125_v24, %v1125_v24 }
 0x29b   :  { %v1097_v29 = vrot.slane %v1090_v25, 4  ;;  %v1128_v30 = vmul.f32 %v1126_v26, %v1126_v26 }
 0x29c   :  { %v1092_v31 = vadd.f32 %v1091_v27, %v1089_v23  ;;  %v1129_v32 = vrot.slane %v1127_v28, 4 }
 0x29d   :  { %v1098_v33 = vadd.f32 %v1097_v29, %v1090_v25  ;;  %v1135_v34 = vrot.slane %v1128_v30, 4 }
 0x29e   :  { %v1093_v35 = vrot.slane %v1092_v31, 2  ;;  %v1130_v36 = vadd.f32 %v1129_v32, %v1127_v28  ;;  %v2336_v32 = vld [vmem:[%s3110_s9 + $0x34] ss:$8 sps:$4 sm:$0xff]  }
 0x29f   :  { %v1099_v37 = vrot.slane %v1098_v33, 2  ;;  %v1136_v38 = vadd.f32 %v1135_v34, %v1128_v30  ;;  %v2333_v30 = vld [vmem:[%s3110_s9 + $0x24] ss:$8 sps:$4 sm:$0xff]  }
 0x2a0   :  { %v1094_v39 = vadd.f32 %v1093_v35, %v1092_v31  ;;  %v1131_v40 = vrot.slane %v1130_v36, 2  ;;  %v2331_v31 = vld [vmem:[%s3110_s9 + $0x20] ss:$8 sps:$4 sm:$0xff]   ;;  %v2339_v34 = vld [vmem:[%s3110_s9 + $0x44] ss:$8 sps:$4 sm:$0xff]  }
 0x2a1   :  { %v1100_v41 = vadd.f32 %v1099_v37, %v1098_v33  ;;  %v1137_v42 = vrot.slane %v1136_v38, 2  ;;  %v2334_v33 = vld [vmem:[%s3110_s9 + $0x30] ss:$8 sps:$4 sm:$0xff]   ;;  %v2337_v35 = vld [vmem:[%s3110_s9 + $0x40] ss:$8 sps:$4 sm:$0xff]  }
 0x2a2   :  { %v1095_v43 = vrot.slane %v1094_v39, 1  ;;  %v1132_v44 = vadd.f32 %v1131_v40, %v1130_v36  ;;  %v2342_v36 = vld [vmem:[%s3110_s9 + $0x54] ss:$8 sps:$4 sm:$0xff]   ;;  %v2340_v37 = vld [vmem:[%s3110_s9 + $0x50] ss:$8 sps:$4 sm:$0xff]  }
 0x2a3   :  { %v1101_v45 = vrot.slane %v1100_v41, 1  ;;  %v1138_v46 = vadd.f32 %v1137_v42, %v1136_v38  ;;  %v2345_v38 = vld [vmem:[%s3110_s9 + $0x64] ss:$8 sps:$4 sm:$0xff]   ;;  %v2348_v40 = vld [vmem:[%s3110_s9 + $0x74] ss:$8 sps:$4 sm:$0xff]   ;;  %v2440_v42 = vmov 0  }
 0x2a4   :  { %v1096_v47 = vadd.f32 %v1095_v43, %v1094_v39  ;;  %v1133_v48 = vrot.slane %v1132_v44, 1  ;;  %v2343_v39 = vld [vmem:[%s3110_s9 + $0x60] ss:$8 sps:$4 sm:$0xff]  }
 0x2a5   :  { %v1102_v49 = vadd.f32 %v1101_v45, %v1100_v41  ;;  %v1139_v50 = vrot.slane %v1138_v46, 1  ;;  %v2346_v41 = vld [vmem:[%s3110_s9 + $0x70] ss:$8 sps:$4 sm:$0xff]  }
 0x2a6   :  { %v1103_v51 = vmul.f32 0.125, %v1096_v47  ;;  %v1134_v52 = vadd.f32 %v1133_v48, %v1132_v44  ;;  %v1997_v47 = vld [vmem:[%s3109_s8] ss:$0 sm:$0xff] }
 0x2a7   :  { %v1104_v53 = vmul.f32 0.125, %v1102_v49  ;;  %v1140_v54 = vadd.f32 %v1139_v50, %v1138_v46 }
 0x2a8   :  { %v1105_v55 = vadd.f32 1e-05, %v1103_v51  ;;  %v1141_v56 = vmul.f32 0.125, %v1134_v52 }
 0x2a9   :  { %v1106_v57 = vadd.f32 1e-05, %v1104_v53  ;;  %v1142_v58 = vmul.f32 0.125, %v1140_v54 }
 0x2aa   :  { %2365 = vrsqrt.f32 %v1105_v55  ;;  %v1143_v59 = vadd.f32 1e-05, %v1141_v56  ;;  %v2349_v55 = vld [vmem:[#allocation2 + $0x40] sm:$0xff]  }
 0x2ab   :  { %2367 = vrsqrt.f32 %v1106_v57  ;;  %v1144_v60 = vadd.f32 1e-05, %v1142_v58  ;;  %v2350_v56 = vld [vmem:[#allocation2] sm:$0xff]   ;;  %v2351_v57 = vld [vmem:[#allocation2 + $0x48] sm:$0xff]  }
 0x2ac   :  { %2369 = vrsqrt.f32 %v1143_v59  ;;  %v2352_v58 = vld [vmem:[#allocation2 + $0x8] sm:$0xff]   ;;  %v2353_v59 = vld [vmem:[#allocation2 + $0x50] sm:$0xff]  }
 0x2ad   :  { %2371 = vrsqrt.f32 %v1144_v60  ;;  %v2354_v60 = vld [vmem:[#allocation2 + $0x10] sm:$0xff]  }
 0x2b4   :  { %v2366_v0 = vpop.eup %2365 }
 0x2b5   :  { %v2368_v2 = vpop.eup %2367  ;;  %v1109_v3 = vmul.f32 %v2366_v0, %v1087_v19  ;;  %v2358_v0 = vld [vmem:[#allocation2 + $0x20] sm:$0xff]  }
 0x2b6   :  { %v2370_v5 = vpop.eup %2369  ;;  %v1110_v6 = vmul.f32 %v2368_v2, %v1088_v21  ;;  %v2325_v21 = vld [vmem:[%s3110_s9] ss:$8 sps:$4 sm:$0xff]  }
 0x2b7   :  { %v2372_v9 = vpop.eup %2371  ;;  %v1161_v11 = vmul.f32 %v1154_v63, %v1109_v3  ;;  %v1147_v12 = vmul.f32 %v2370_v5, %v1125_v24  ;;  %v2330_v24 = vld [vmem:[%s3110_s9 + $0x14] ss:$8 sps:$4 sm:$0xff]   ;;  %v2360_v2 = vld [vmem:[#allocation2 + $0x28] sm:$0xff]  }
 0x2b8   :  { %v1148_v13 = vmul.f32 %v2372_v9, %v1126_v26  ;;  %v1162_v14 = vmul.f32 %v1158_v1, %v1110_v6  ;;  %v2328_v26 = vld [vmem:[%s3110_s9 + $0x10] ss:$8 sps:$4 sm:$0xff]  }
 0x2b9   :  { %v1163_v15 = vmul.f32 %v1154_v63, %v1147_v12  ;;  %v1177_v16 = vadd.f32 %v1170_v4, %v1161_v11  ;;  %v2357_v63 = vld [vmem:[#allocation2 + $0x60] sm:$0xff]   ;;  %v2361_v3 = vld [vmem:[#allocation2 + $0x70] sm:$0xff]   ;;  %v2363_v5 = vld [vmem:[#allocation2 + $0x78] sm:$0xff]  }
 0x2ba   :  { %v1164_v17 = vmul.f32 %v1158_v1, %v1148_v13  ;;  %v1178_v18 = vadd.f32 %v1174_v7, %v1162_v14  ;;  %v2359_v1 = vld [vmem:[#allocation2 + $0x68] sm:$0xff]   ;;  %v2364_v6 = vld [vmem:[#allocation2 + $0x38] sm:$0xff]  }
 0x2bb   :  { %v1179_v20 = vadd.f32 %v1170_v4, %v1163_v15  ;;  %v1181_v23 = vmax.f32 %v1177_v16, 0.0  ;;  %v2362_v4 = vld [vmem:[#allocation2 + $0x30] sm:$0xff]  }
 0x2bc   :  { %v1180_v22 = vadd.f32 %v1174_v7, %v1164_v17  ;;  %v1182_v19 = vmax.f32 %v1178_v18, 0.0  ;;  %v1380_v7 = vld [vmem:[%s3111_s10] sm:$0x3] }
 0x2bd   :  { %v1183_v25 = vmax.f32 %v1179_v20, 0.0  ;;  %v1385_v9 = vrot.slane %v1380_v7, %v2936_v8  ;;  %v1389_v11 = vrot.slane %v1380_v7, %v2941_v10 }
 0x2be   :  { %v1184_v27 = vmax.f32 %v1180_v22, 0.0 }
 0x2bf   :  { %v1185_v28 = vpack.c.bf16 %v1183_v25, %v1181_v23 }
 0x2c0   :  { %v1186_v29 = vpack.c.bf16 %v1184_v27, %v1182_v19 }
 0x2c2   :  { %1354 = vmatprep.mubr.bf16.mxu1 %v1186_v29 }
 0x2c3   :  { %1355 = vmatmul.mubr.bf16.vlgmr.msra.gmra.mrb[4].mxu1 %v1185_v28 }
 0x2c4   :  { %1473 = vmatpush1.bf16.msra.mxu1 %v2325_v21  ;;  %1504 = vmatprep.mubr.bf16.mxu1 %v2440_v42 }
 0x2c5   :  { %1474 = vmatprep.subr.bf16.mxu1 %v2330_v24 }
 0x2c8   :  { %1475 = vmatpush1.bf16.msra.mxu1 %v2328_v26 }
 0x2c9   :  { %1476 = vmatprep.subr.bf16.mxu1 %v2333_v30 }
 0x2cc   :  { %1477 = vmatpush1.bf16.msra.mxu1 %v2331_v31 }
 0x2cd   :  { %1478 = vmatprep.subr.bf16.mxu1 %v2336_v32 }
 0x2d0   :  { %1479 = vmatpush1.bf16.msra.mxu1 %v2334_v33 }
 0x2d1   :  { %1480 = vmatprep.subr.bf16.mxu1 %v2339_v34 }
 0x2d4   :  { %1481 = vmatpush1.bf16.msra.mxu1 %v2337_v35 }
 0x2d5   :  { %1482 = vmatprep.subr.bf16.mxu1 %v2342_v36 }
 0x2d8   :  { %1483 = vmatpush1.bf16.msra.mxu1 %v2340_v37 }
 0x2d9   :  { %1484 = vmatprep.subr.bf16.mxu1 %v2345_v38 }
 0x2dc   :  { %1485 = vmatpush1.bf16.msra.mxu1 %v2343_v39 }
 0x2dd   :  { %1486 = vmatprep.subr.bf16.mxu1 %v2348_v40 }
 0x2e0   :  { %1487 = vmatpush1.bf16.msra.mxu1 %v2346_v41 }
 0x2e1   :  { %2069 = vmatprep.subr.bf16.mxu1 %v2349_v55 }
 0x396   :  { %v2063_v43 = vpop.f32.mrb[4].mxu1 }
 0x397   :  { %v2064_v44 = vpop.f32.mrb[5].mxu1 }
 0x398   :  { %v2065_v45 = vadd.f32 %v2064_v44, %v2063_v43  ;;  %v2066_v46 = vpop.f32.mrb[6].mxu1 }
 0x399   :  { %v2067_v48 = vpop.f32.mrb[7].mxu1 }
 0x39a   :  { %v2068_v49 = vadd.f32 %v2067_v48, %v2066_v46  ;;  %v3059_v50 = vadd.f32 %v2065_v45, %v1997_v47 }
 0x39c   :  { %v3061_v51 = vadd.f32 %v2068_v49, %v1997_v47  ;;  %v1818_v54 = vmul.f32 %v3059_v50, %v3059_v50 }
 0x39e   :  { %v1363_v52 = vpack.c.bf16 %v3061_v51, %v3059_v50  ;;  %v1817_v53 = vmul.f32 %v3061_v51, %v3061_v51 }
 0x3a0   :  { %1819 = vadd.xlane.f32.xlu1 %v1817_v53  ;;  %1505 = vmatmul.mubr.bf16.vlgmr.msra.gmra.mrb[8].mxu1 %v1363_v52 }
 0x3a1   :  { %2070 = vmatpush3.bf16.msra.mxu1 %v2350_v56 }
 0x3a2   :  { %2071 = vmatprep.subr.bf16.mxu1 %v2351_v57 }
 0x3a4   :  { %1821 = vadd.xlane.f32.xlu1 %v1818_v54 }
 0x3a5   :  { %2072 = vmatpush3.bf16.msra.mxu1 %v2352_v58 }
 0x3a6   :  { %2073 = vmatprep.subr.bf16.mxu1 %v2353_v59 }
 0x3a9   :  { %2074 = vmatpush3.bf16.msra.mxu1 %v2354_v60 }
 0x3aa   :  { %2075 = vmatprep.subr.bf16.mxu1 %v2355_v61 }
 0x3ad   :  { %2076 = vmatpush3.bf16.msra.mxu1 %v2356_v62 }
 0x3ae   :  { %2077 = vmatprep.subr.bf16.mxu1 %v2357_v63 }
 0x3b1   :  { %2078 = vmatpush3.bf16.msra.mxu1 %v2358_v0 }
 0x3b2   :  { %2079 = vmatprep.subr.bf16.mxu1 %v2359_v1 }
 0x3b5   :  { %2080 = vmatpush3.bf16.msra.mxu1 %v2360_v2 }
 0x3b6   :  { %2081 = vmatprep.subr.bf16.mxu1 %v2361_v3 }
 0x3b9   :  { %2082 = vmatpush3.bf16.msra.mxu1 %v2362_v4 }
 0x3ba   :  { %2083 = vmatprep.subr.bf16.mxu1 %v2363_v5 }
 0x3bd   :  { %2084 = vmatpush3.bf16.msra.mxu1 %v2364_v6 }
 0x473   :  { %v1506_v12 = vpop.f32.mrb[8].mxu1 }
 0x474   :  { %v1507_v13 = vadd.f32 %v1506_v12, %v1385_v9  ;;  %v1508_v14 = vpop.f32.mrb[9].mxu1 }
 0x475   :  { %v1509_v15 = vadd.f32 %v1508_v14, %v1389_v11  ;;  %v1510_v16 = vpop.f32.mrb[10].mxu1 }
 0x476   :  { %v1515_v17 = vrot.slane %v1507_v13, 4  ;;  %v1511_v18 = vadd.f32 %v1510_v16, %v1385_v9  ;;  %v1512_v20 = vpop.f32.mrb[11].mxu1 }
 0x477   :  { %v1521_v22 = vrot.slane %v1509_v15, 4  ;;  %v1513_v23 = vadd.f32 %v1512_v20, %v1389_v11 }
 0x478   :  { %v1516_v25 = vadd.f32 %v1515_v17, %v1507_v13  ;;  %v1553_v19 = vrot.slane %v1511_v18, 4 }
 0x479   :  { %v1522_v27 = vadd.f32 %v1521_v22, %v1509_v15  ;;  %v1559_v28 = vrot.slane %v1513_v23, 4 }
 0x47a   :  { %v1517_v29 = vrot.slane %v1516_v25, 2  ;;  %v1554_v21 = vadd.f32 %v1553_v19, %v1511_v18 }
 0x47b   :  { %v1523_v24 = vrot.slane %v1522_v27, 2  ;;  %v1560_v26 = vadd.f32 %v1559_v28, %v1513_v23 }
 0x47c   :  { %v1518_v30 = vadd.f32 %v1517_v29, %v1516_v25  ;;  %v1555_v31 = vrot.slane %v1554_v21, 2 }
 0x47d   :  { %v1524_v32 = vadd.f32 %v1523_v24, %v1522_v27  ;;  %v1561_v33 = vrot.slane %v1560_v26, 2  ;;  %v1591_v24 = vld [vmem:[%s3112_s11] sm:$0x3] }
 0x47e   :  { %v1519_v34 = vrot.slane %v1518_v30, 1  ;;  %v1556_v35 = vadd.f32 %v1555_v31, %v1554_v21 }
 0x47f   :  { %v1525_v36 = vrot.slane %v1524_v32, 1  ;;  %v1562_v37 = vadd.f32 %v1561_v33, %v1560_v26  ;;  %v1607_v26 = vld [vmem:[%s3113_s12] sm:$0x3] }
 0x480   :  { %v1520_v38 = vadd.f32 %v1519_v34, %v1518_v30  ;;  %v1557_v39 = vrot.slane %v1556_v35, 1  ;;  %v1596_v30 = vrot.slane %v1591_v24, %v2936_v8 }
 0x481   :  { %v1526_v40 = vadd.f32 %v1525_v36, %v1524_v32  ;;  %v1563_v41 = vrot.slane %v1562_v37, 1  ;;  %v1600_v32 = vrot.slane %v1591_v24, %v2941_v10 }
 0x482   :  { %v1527_v42 = vmul.f32 0.125, %v1520_v38  ;;  %v1558_v43 = vadd.f32 %v1557_v39, %v1556_v35  ;;  %v1612_v35 = vrot.slane %v1607_v26, %v2936_v8  ;;  %v1616_v38 = vrot.slane %v1607_v26, %v2941_v10 }
 0x483   :  { %v1528_v44 = vmul.f32 0.125, %v1526_v40  ;;  %v1564_v45 = vadd.f32 %v1563_v41, %v1562_v37 }
 0x484   :  { %v1529_v46 = vsub.f32 %v1507_v13, %v1527_v42  ;;  %v1565_v47 = vmul.f32 0.125, %v1558_v43 }
 0x485   :  { %v1530_v48 = vsub.f32 %v1509_v15, %v1528_v44  ;;  %v1566_v49 = vmul.f32 0.125, %v1564_v45 }
 0x486   :  { %v1531_v52 = vmul.f32 %v1529_v46, %v1529_v46  ;;  %v1567_v53 = vsub.f32 %v1511_v18, %v1565_v47 }
 0x487   :  { %v1532_v54 = vmul.f32 %v1530_v48, %v1530_v48  ;;  %v1568_v55 = vsub.f32 %v1513_v23, %v1566_v49 }
 0x488   :  { %v1533_v56 = vrot.slane %v1531_v52, 4  ;;  %v1569_v57 = vmul.f32 %v1567_v53, %v1567_v53 }
 0x489   :  { %v1539_v58 = vrot.slane %v1532_v54, 4  ;;  %v1570_v59 = vmul.f32 %v1568_v55, %v1568_v55 }
 0x48a   :  { %v1534_v60 = vadd.f32 %v1533_v56, %v1531_v52  ;;  %v1571_v61 = vrot.slane %v1569_v57, 4 }
 0x48b   :  { %v1540_v62 = vadd.f32 %v1539_v58, %v1532_v54  ;;  %v1577_v63 = vrot.slane %v1570_v59, 4 }
 0x48c   :  { %v1535_v0 = vrot.slane %v1534_v60, 2  ;;  %v1572_v1 = vadd.f32 %v1571_v61, %v1569_v57 }
 0x48d   :  { %v1541_v2 = vrot.slane %v1540_v62, 2  ;;  %v1578_v3 = vadd.f32 %v1577_v63, %v1570_v59 }
 0x48e   :  { %v1536_v4 = vadd.f32 %v1535_v0, %v1534_v60  ;;  %v1573_v5 = vrot.slane %v1572_v1, 2 }
 0x48f   :  { %v1542_v6 = vadd.f32 %v1541_v2, %v1540_v62  ;;  %v1579_v7 = vrot.slane %v1578_v3, 2 }
 0x490   :  { %v1537_v9 = vrot.slane %v1536_v4, 1  ;;  %v1574_v11 = vadd.f32 %v1573_v5, %v1572_v1 }
 0x491   :  { %v1543_v12 = vrot.slane %v1542_v6, 1  ;;  %v1580_v13 = vadd.f32 %v1579_v7, %v1578_v3  ;;  %v1820_v3 = vpop.xlane.xlu1 %1819 }
 0x492   :  { %v1538_v14 = vadd.f32 %v1537_v9, %v1536_v4  ;;  %v1575_v15 = vrot.slane %v1574_v11, 1  ;;  %v1823_v4 = vmax.f32 %v1820_v3, 1e-24 }
 0x493   :  { %v1544_v16 = vadd.f32 %v1543_v12, %v1542_v6  ;;  %v1581_v17 = vrot.slane %v1580_v13, 1 }
 0x494   :  { %v1545_v18 = vmul.f32 0.125, %v1538_v14  ;;  %v1576_v20 = vadd.f32 %v1575_v15, %v1574_v11 }
 0x495   :  { %v1546_v22 = vmul.f32 0.125, %v1544_v16  ;;  %v1582_v23 = vadd.f32 %v1581_v17, %v1580_v13  ;;  %v1822_v5 = vpop.xlane.xlu1 %1821 }
 0x496   :  { %v1547_v25 = vadd.f32 1e-05, %v1545_v18  ;;  %v1583_v19 = vmul.f32 0.125, %v1576_v20  ;;  %v1824_v7 = vmax.f32 %v1822_v5, 1e-24 }
 0x497   :  { %v1548_v27 = vadd.f32 1e-05, %v1546_v22  ;;  %v1584_v28 = vmul.f32 0.125, %v1582_v23 }
 0x498   :  { %2373 = vrsqrt.f32 %v1547_v25  ;;  %v1585_v29 = vadd.f32 1e-05, %v1583_v19 }
 0x499   :  { %2375 = vrsqrt.f32 %v1548_v27  ;;  %v1586_v21 = vadd.f32 1e-05, %v1584_v28 }
 0x49a   :  { %2377 = vrsqrt.f32 %v1585_v29 }
 0x49b   :  { %2379 = vrsqrt.f32 %v1586_v21 }
 0x49c   :  { %2381 = vrsqrt.f32 %v1823_v4 }
 0x4a2   :  { %v2374_v31 = vpop.eup %2373 }
 0x4a3   :  { %v2376_v33 = vpop.eup %2375  ;;  %v1551_v34 = vmul.f32 %v2374_v31, %v1529_v46 }
 0x4a4   :  { %v2378_v36 = vpop.eup %2377  ;;  %v1552_v37 = vmul.f32 %v2376_v33, %v1530_v48 }
 0x4a5   :  { %v2380_v39 = vpop.eup %2379  ;;  %v1603_v40 = vmul.f32 %v1596_v30, %v1551_v34  ;;  %v1589_v41 = vmul.f32 %v2378_v36, %v1567_v53  ;;  %v2030_v53 = vld [vmem:[%s3115_s14] ss:$0 sm:$0xff]  ;;  %s2441_s14 = smov [#allocation5]  }
 0x4a6   :  { %v1590_v42 = vmul.f32 %v2380_v39, %v1568_v55  ;;  %v1604_v43 = vmul.f32 %v1600_v32, %v1552_v37  ;;  %v2382_v13 = vpop.eup %2381  ;;  %s1854_s18 = sshll.u32 %s2441_s14, 4  ;;  %s1855_s18 = int_to_ptr.vmem [resolvable:$true] %s1854_s18 }
 0x4a7   :  { %v1605_v44 = vmul.f32 %v1596_v30, %v1589_v41  ;;  %v1619_v45 = vadd.f32 %v1612_v35, %v1603_v40  ;;  %v1827_v16 = vmul.f32 %v2382_v13, %v3061_v51  ;;  %s2411_s20 = scalar_lea.vmem %s1855_s18, 16  ;;  %s2415_s21 = scalar_lea.vmem %s1855_s18, 32 }
 0x4a8   :  { %v1606_v47 = vmul.f32 %v1600_v32, %v1590_v42  ;;  %v1620_v49 = vadd.f32 %v1616_v38, %v1604_v43  ;;  %p2412_p8 = scmp.ne.s32.totalorder %s1855_s18, %s2411_s20  ;;  %p2416_p9 = scmp.lt.s32.totalorder %s1855_s18, %s1855_s18 }
 0x4a9   :  { %v1621_v52 = vadd.f32 %v1612_v35, %v1605_v44  ;;  %v1623_v56 = vmax.f32 %v1619_v45, 0.0  ;;  %p2417_p10 = scmp.lt.s32.totalorder %s2415_s21, %s2411_s20 }
 0x4aa   :  { %v1622_v54 = vadd.f32 %v1616_v38, %v1606_v47  ;;  %v1624_v46 = vmax.f32 %v1620_v49, 0.0 }
 0x4ab   :  { %v1625_v57 = vmax.f32 %v1621_v52, 0.0  ;;  %p2418_p11 = por %p2417_p10, %p2416_p9 }
 0x4ac   :  { %v1626_v58 = vmax.f32 %v1622_v54, 0.0 }
 0x4ad   :  { %v1627_v8 = vpack.c.bf16 %v1625_v57, %v1623_v56  ;;  %p2419_p12 = pnand %p2418_p11, %p2412_p8 }
 0x4ae   :  { %v1628_v59 = vpack.c.bf16 %v1626_v58, %v1624_v46 }
 0x4b0   :  { %1796 = vmatprep.mubr.bf16.mxu1 %v1628_v59 }
 0x4b1   :  { %1797 = vmatmul.mubr.bf16.vlgmr.msra.gmra.mrb[12].mxu1 %v1627_v8 }
 0x584   :  { %v2085_v10 = vpop.f32.mrb[12].mxu1 }
 0x585   :  { %v2086_v48 = vpop.f32.mrb[13].mxu1 }
 0x586   :  { %v2087_v55 = vadd.f32 %v2086_v48, %v2085_v10  ;;  %v2088_v60 = vpop.f32.mrb[14].mxu1 }
 0x587   :  { %v2089_v61 = vpop.f32.mrb[15].mxu1 }
 0x588   :  { %v2090_v62 = vadd.f32 %v2089_v61, %v2088_v60  ;;  %v1799_v63 = vadd.f32 %v2087_v55, %v2030_v53 }
 0x58a   :  { %v1802_v0 = vadd.f32 %v2090_v62, %v2030_v53  ;;  %v1805_v1 = vmul.f32 %v1799_v63, %v1799_v63 }
 0x58c   :  { %1807 = vadd.xlane.f32.xlu0 %v1805_v1  ;;  %v1806_v2 = vmul.f32 %v1802_v0, %v1802_v0 }
 0x590   :  { %1809 = vadd.xlane.f32.xlu0 %v1806_v2 }
 0x619   :  { %v1808_v6 = vpop.xlane.xlu0 %1807 }
 0x61a   :  { %v1811_v9 = vmax.f32 %v1808_v6, 1e-24 }
 0x61c   :  { %2383 = vrsqrt.f32 %v1811_v9 }
 0x61d   :  { %v1810_v11 = vpop.xlane.xlu0 %1809  ;;  %2385 = vrsqrt.f32 %v1824_v7 }
 0x61e   :  { %v1812_v12 = vmax.f32 %v1810_v11, 1e-24 }
 0x620   :  { %2387 = vrsqrt.f32 %v1812_v12 }
 0x626   :  { %v2384_v14 = vpop.eup %2383 }
 0x627   :  { %v1815_v15 = vmul.f32 %v2384_v14, %v1799_v63  ;;  %v2386_v17 = vpop.eup %2385 }
 0x628   :  { %v1828_v23 = vmul.f32 %v2386_v17, %v3059_v50 }
 0x629   :  { %v1829_v18 = vmul.f32 %v1827_v16, %v1815_v15 }
 0x62a   :  { %v2388_v20 = vpop.eup %2387 }
 0x62b   :  { %1831 = vadd.xlane.f32.xlu0 %v1829_v18  ;;  %v1816_v22 = vmul.f32 %v2388_v20, %v1802_v0 }
 0x62d   :  { %v1830_v25 = vmul.f32 %v1828_v23, %v1816_v22 }
 0x62f   :  { %1833 = vadd.xlane.f32.xlu1 %v1830_v25 }
 0x6b8   :  { %v1832_v19 = vpop.xlane.xlu0 %1831 }
 0x6bc   :  { %v1834_v27 = vpop.xlane.xlu1 %1833 }
 0x6bd   :  { %v1835_v28 = vadd.f32 %v1834_v27, %v1832_v19 }
 0x6bf   :  { %v1836_v29 = vrot.slane %v1835_v28, 4 }
 0x6c1   :  { %v1837_v21 = vadd.f32 %v1836_v29, %v1835_v28 }
 0x6c3   :  { %v1838_v24 = vrot.slane %v1837_v21, 2 }
 0x6c5   :  { %v1839_v26 = vadd.f32 %v1838_v24, %v1837_v21 }
 0x6c7   :  { %v1840_v30 = vrot.slane %v1839_v26, 1 }
 0x6c9   :  { %v1841_v31 = vadd.f32 %v1840_v30, %v1839_v26 }
 0x6cb   :  { %v1843_v32 = vmul.f32 0.0625, %v1841_v31 }
 0x6cd   :  { %v1844_v51 = vmul.f32 4.0, %v1843_v32 }
 0x6cf   :  { %v1845_v33 = vsub.f32 4.0, %v1844_v51 }
 0x6d1   :  { %1847 = vst.msk [vmem:[#allocation5] sm:$0x1] %vm1846_vm0, %v1845_v33 }
 0x6d2   :  { %2422 = shalt.err (!%p2419_p12)
}
 0x6d3   :  { %s2423_s24 = scalar_lea.hbm %s3116_s15, 16 }
 0x6d4   :  { %p2424_p13 = scmp.ne.s32.totalorder %s3116_s15, %s2423_s24  ;;  %p2427_p0 = scmp.lt.u32.totalorder %s2423_s24, %s3116_s15 }
 0x6d6   :  { %p2429_p1 = pnand %p2427_p0, %p2424_p13 }
 0x6d8   :  { %2432 = shalt.err (!%p2429_p1)
}
 0x6d9   :  { %1857 = dma.vmem_to_hbm [thread:$0]  %s1855_s18, 16, %s3116_s15, [#allocation4]  }
 0x6da   :  { %2435 = dma.done.wait [#allocation4], 16  }
 0x6db   :  { %2436 = vsyncadd [#allocation4], 4294967280 }
 0x6dc   :  { %1861 = vsyncpa [#allocation3], 1 }
 0x6dd   :  { %1862 = vsyncpa [#allocation4], 1 }

</bundles_post_ra>
